<compile_context>
chip_gen: v6e
topology: v6e:2x2x1
jax: 0.10.0
libtpu: 0.0.40
codegen_flags: <defaults>
</compile_context>

<pallas_src>
import functools
import math

import numpy as np
import jax
import jax.numpy as jnp
from jax import lax
from jax.experimental import pallas as pl
from jax.experimental.pallas import tpu as pltpu

EPS = 1e-5  # nn.GroupNorm default


def _group_norm_slab(x3, gamma, beta, n_per_group, gmap):
    """GroupNorm on a (Bt, S, C) token-major slab (stats per batch element).

    gmap is None when channels-per-group == 1 (default config norm_group == C):
    per-channel stats are used directly (no group-map matmuls).
    """
    ch_sum = jnp.sum(x3, axis=1)                 # (Bt, C)
    ch_sq = jnp.sum(x3 * x3, axis=1)             # (Bt, C)
    inv_n = 1.0 / n_per_group
    if gmap is None:
        mean_c = ch_sum * inv_n
        var_c = ch_sq * inv_n - mean_c * mean_c
    else:
        grp_sum = jnp.dot(ch_sum, gmap, preferred_element_type=jnp.float32)   # (Bt, G)
        grp_sq = jnp.dot(ch_sq, gmap, preferred_element_type=jnp.float32)     # (Bt, G)
        mean_g = grp_sum * inv_n
        var_g = grp_sq * inv_n - mean_g * mean_g
        dn = (((1,), (1,)), ((), ()))            # (Bt,G) x (C,G) contracting G -> (Bt,C)
        mean_c = lax.dot_general(mean_g, gmap, dn, preferred_element_type=jnp.float32)
        var_c = lax.dot_general(var_g, gmap, dn, preferred_element_type=jnp.float32)
    var_c = jnp.maximum(var_c, 0.0)              # guard E[x^2]-mean^2 cancellation
    inv = lax.rsqrt(var_c + EPS)
    return (x3 - mean_c[:, None, :]) * (inv[:, None, :] * gamma) + beta


def cross_attention_kernel(*refs, num_head, cg, n_per_group_q, n_per_group_kv):
    if cg > 1:
        (z_ref, addin_ref, rows_ref, qpos_ref, kvpos_ref,
         wq_ref, wk_ref, wvo_ref, gmap_ref, o_ref) = refs
        gmap = gmap_ref[...]
    else:  # default config: one channel per group -> no gmap input at all
        (z_ref, addin_ref, rows_ref, qpos_ref, kvpos_ref,
         wq_ref, wk_ref, wvo_ref, o_ref) = refs
        gmap = None

    z3 = z_ref[...]          # (Bt, S, C)   -- original z (residual path)
    addin3 = addin_ref[...]  # (Bt, Skv, C)
    rows = rows_ref[...]     # (8, C) packed row params

    Bt, S, C = z3.shape
    Skv = addin3.shape[1]
    Dh = C // num_head

    q_gamma, q_beta = rows[0:1], rows[1:2]
    kv_gamma, kv_beta = rows[2:3], rows[3:4]
    bq, bk, bo = rows[4:5], rows[5:6], rows[6:7]   # bo = out_bias + bv @ Wo (folded)

    # GroupNorm (per batch element within the slab) + positional embeddings.
    q3 = _group_norm_slab(z3, q_gamma, q_beta, n_per_group_q, gmap) + qpos_ref[...][None]
    kv3 = _group_norm_slab(addin3, kv_gamma, kv_beta, n_per_group_kv, gmap) + kvpos_ref[...][None]

    # Projections on the flattened (Bt*S, C) slab -> tall MXU M dimension.
    q2 = q3.reshape(Bt * S, C)
    kv2 = kv3.reshape(Bt * Skv, C)

    # Wq/bq already carry the 1/sqrt(Dh) attention scale (folded in the wrapper).
    Q = (jnp.dot(q2, wq_ref[...], preferred_element_type=jnp.float32) + bq).reshape(Bt, S, C)
    K = (jnp.dot(kv2, wk_ref[...], preferred_element_type=jnp.float32) + bk).reshape(Bt, Skv, C)
    # V projection fused with the output projection per head (no bias: bv was
    # folded through Wo into bo in the wrapper).  Lane-dense N = num_head*C.
    VWO = jnp.dot(kv2, wvo_ref[...],
                  preferred_element_type=jnp.float32).reshape(Bt, Skv, num_head * C)

    # Multi-head attention: batched over Bt via 3-D einsums (single leading
    # batch dim).  Only the constant num_head(=4)-wide loop is unrolled, so the
    # trace size does not grow with Bt.  Wo is pre-fused per head, so each head
    # contributes a full-width (S, C) update -> no lane concat, no out-proj dot.
    attn_out = jnp.zeros((Bt, S, C), jnp.float32)
    for h in range(num_head):
        lo = h * Dh
        Qh = Q[:, :, lo:lo + Dh]                  # (Bt, S, Dh)
        Kh = K[:, :, lo:lo + Dh]                  # (Bt, Skv, Dh)
        Vh = VWO[:, :, h * C:(h + 1) * C]         # (Bt, Skv, C) == V_h @ Wo_h
        s = jnp.einsum('bqd,bkd->bqk', Qh, Kh,
                       preferred_element_type=jnp.float32)      # (Bt, S, Skv)
        m = jnp.max(s, axis=-1, keepdims=True)
        e = jnp.exp(s - m)
        denom = jnp.sum(e, axis=-1, keepdims=True)
        p = e * pl.reciprocal(denom, approx=True)                # EUP slot -> ~free
        # TODO(synk): attention-weight dropout (p=0.1) is identity in eval mode.
        attn_out = attn_out + jnp.einsum('bqk,bkc->bqc', p, Vh,
                                         preferred_element_type=jnp.float32)

    # Residual + (folded) bias + SiLU.
    # TODO(synk): resid_dropout (p=0.1) is identity in eval mode.
    y = z3 + attn_out + bo[None]
    y = y * jax.nn.sigmoid(y)
    # Lane-dense store: S*C is a multiple of 128 -> unmasked vector stores.
    o_ref[...] = y.reshape(1, Bt, S * C)


def _pick_block_batch(B, S, Skv, C, num_head, row_cap=1024, vmem_budget=20 << 20):
    """Batch elements per grid step.

    Fatten grid steps (per-step fixed overhead ~0.35us dominates at these tiny
    shapes) up to ~row_cap rows of the flattened (Bt*S, C) slab, bounded by a
    conservative per-step VMEM estimate (valid for v7x's 32 MiB scoped default
    as well as v5e/v6e), while keeping >= 2 grid steps whenever B >= 2 so both
    v7x TensorCores get work.
    """
    # Conservative f32 bytes per batch element inside one step: double-buffered
    # in/out blocks + normed/projected activations + score/prob tiles
    # (lane padding of the (S, Skv) tiles accounted with max(Skv, 128)).
    per_b = 4 * (6 * S * C + 4 * Skv * C
                 + 3 * num_head * S * max(Skv, 128)
                 + Skv * num_head * C + 2 * S * C)
    divisors = [d for d in range(1, B + 1) if B % d == 0]
    cands = [d for d in divisors if d * S <= row_cap and d * per_b <= vmem_budget] or [1]
    bt = max(cands)
    if bt == B and B > 1:      # prefer >= 2 grid steps (v7x has 2 TensorCores)
        smaller = [d for d in cands if d < B]
        if smaller:
            bt = max(smaller)
    return bt


def cross_attention_block(z, addin, params, *, num_head=4, norm_group=32):
    """z, addin: NCHW float32. Returns NCHW float32."""
    B, C, H, W = z.shape
    S = H * W
    Skv = addin.shape[2] * addin.shape[3]
    G = norm_group
    Cg = C // G
    Dh = C // num_head
    scale = 1.0 / math.sqrt(Dh)

    # NCHW -> (B, S, C) token-major (pure layout plumbing at the boundary).
    z_seq = jnp.transpose(z, (0, 2, 3, 1)).reshape(B, S, C)
    addin_seq = jnp.transpose(addin, (0, 2, 3, 1)).reshape(B, Skv, C)

    # Split in_proj, pre-transpose (torch computes x @ W^T), fold the attention
    # scale into the Q projection, and fuse the out projection into the V
    # projection per head:   Wvo[:, h*C:(h+1)*C] = Wv_h @ Wo_h  (C, num_head*C).
    Wq = params["in_proj_weight"][:C].T * scale
    Wk = params["in_proj_weight"][C:2 * C].T
    Wv = params["in_proj_weight"][2 * C:].T
    Wo = params["out_proj_weight"].T
    Wvo = jnp.concatenate(
        [Wv[:, h * Dh:(h + 1) * Dh] @ Wo[h * Dh:(h + 1) * Dh, :] for h in range(num_head)],
        axis=1)

    bq = params["in_proj_bias"][:C] * scale
    bk = params["in_proj_bias"][C:2 * C]
    bv = params["in_proj_bias"][2 * C:]
    bo = params["out_proj_bias"] + bv @ Wo        # V bias folded (exactly) through Wo

    # Pack all (C,) row parameters into a single (8, C) input -> one DMA / one tile.
    rows = jnp.stack([
        params["q_gamma"], params["q_beta"],
        params["kv_gamma"], params["kv_beta"],
        bq, bk, bo, jnp.zeros((C,), jnp.float32),
    ], axis=0).astype(jnp.float32)

    Bt = _pick_block_batch(B, S, Skv, C, num_head)
    nsteps = B // Bt
    grid = (nsteps,)

    in_specs = [
        pl.BlockSpec((Bt, S, C), lambda i: (i, 0, 0)),       # z
        pl.BlockSpec((Bt, Skv, C), lambda i: (i, 0, 0)),     # addin
        pl.BlockSpec((8, C), lambda i: (0, 0)),              # packed row params
        pl.BlockSpec((S, C), lambda i: (0, 0)),              # q_pos_emb
        pl.BlockSpec((Skv, C), lambda i: (0, 0)),            # kv_pos_emb
        pl.BlockSpec((C, C), lambda i: (0, 0)),              # Wq (scaled)
        pl.BlockSpec((C, C), lambda i: (0, 0)),              # Wk
        pl.BlockSpec((C, num_head * C), lambda i: (0, 0)),   # Wvo (V fused with Wo)
    ]
    args = [z_seq, addin_seq, rows,
            params["q_pos_emb"], params["kv_pos_emb"],
            Wq.astype(jnp.float32), Wk.astype(jnp.float32), Wvo.astype(jnp.float32)]
    if Cg > 1:   # general GroupNorm path (norm_group < channels)
        gmap = (jnp.arange(C)[:, None] // Cg == jnp.arange(G)[None, :]).astype(jnp.float32)
        in_specs.append(pl.BlockSpec((C, G), lambda i: (0, 0)))
        args.append(gmap)

    kernel = functools.partial(
        cross_attention_kernel,
        num_head=num_head, cg=Cg,
        n_per_group_q=float(S * Cg), n_per_group_kv=float(Skv * Cg),
    )

    # Advisory cost estimate: lets XLA overlap the surrounding layout ops.
    flops = 2 * B * (S * C * C + Skv * C * C + Skv * C * (num_head * C)
                     + num_head * S * Skv * Dh + num_head * S * Skv * C)
    transcendentals = B * (num_head * S * Skv + S * C)
    bytes_accessed = 4 * (2 * B * S * C + B * Skv * C + S * C + Skv * C
                          + 2 * C * C + C * num_head * C + 8 * C)

    # Lane-dense output: (nsteps, Bt, S*C); block's minor dims are (Bt, S*C)
    # (Bt == full dim, S*C == full dim and a multiple of 128 at default config).
    out = pl.pallas_call(
        kernel,
        out_shape=jax.ShapeDtypeStruct((nsteps, Bt, S * C), jnp.float32),
        grid=grid,
        in_specs=in_specs,
        out_specs=pl.BlockSpec((1, Bt, S * C), lambda i: (i, 0, 0)),
        compiler_params=pltpu.CompilerParams(
            dimension_semantics=("parallel",),
            vmem_limit_bytes=32 * 1024 * 1024,   # <= scoped/physical VMEM on v5e/v6e/v7x
        ),
        cost_estimate=pl.CostEstimate(flops=flops, transcendentals=transcendentals,
                                      bytes_accessed=bytes_accessed),
    )(*args)

    # (nsteps, Bt, S*C) -> (B, S, C) -> NCHW (layout plumbing in the wrapper).
    out_seq = out.reshape(B, S, C)
    return jnp.transpose(out_seq.reshape(B, H, W, C), (0, 3, 1, 2))


# ----------------------- pure-JAX reference (for validation) -----------------------
def _ref_group_norm_nchw(x, gamma, beta, G):
    B, C, H, W = x.shape
    xg = x.reshape(B, G, C // G, H, W)
    mean = xg.mean(axis=(2, 3, 4), keepdims=True)
    var = ((xg - mean) ** 2).mean(axis=(2, 3, 4), keepdims=True)
    xn = ((xg - mean) / jnp.sqrt(var + EPS)).reshape(B, C, H, W)
    return xn * gamma[None, :, None, None] + beta[None, :, None, None]


def ref_forward(z, addin, params, *, num_head=4, norm_group=32):
    B, C, H, W = z.shape
    S = H * W
    Dh = C // num_head
    kv = _ref_group_norm_nchw(addin, params["kv_gamma"], params["kv_beta"], norm_group)
    kv = jnp.transpose(kv, (0, 2, 3, 1)).reshape(B, -1, C) + params["kv_pos_emb"]
    q = _ref_group_norm_nchw(z, params["q_gamma"], params["q_beta"], norm_group)
    q = jnp.transpose(q, (0, 2, 3, 1)).reshape(B, -1, C) + params["q_pos_emb"]

    Q = q @ params["in_proj_weight"][:C].T + params["in_proj_bias"][:C]
    K = kv @ params["in_proj_weight"][C:2 * C].T + params["in_proj_bias"][C:2 * C]
    V = kv @ params["in_proj_weight"][2 * C:].T + params["in_proj_bias"][2 * C:]

    Qh = Q.reshape(B, S, num_head, Dh).transpose(0, 2, 1, 3)
    Kh = K.reshape(B, -1, num_head, Dh).transpose(0, 2, 1, 3)
    Vh = V.reshape(B, -1, num_head, Dh).transpose(0, 2, 1, 3)
    scores = jnp.einsum("bhqd,bhkd->bhqk", Qh, Kh) / math.sqrt(Dh)
    probs = jax.nn.softmax(scores, axis=-1)
    attn = jnp.einsum("bhqk,bhkd->bhqd", probs, Vh).transpose(0, 2, 1, 3).reshape(B, S, C)
    attn = attn @ params["out_proj_weight"].T + params["out_proj_bias"]
    attn = jnp.transpose(attn, (0, 2, 1)).reshape(z.shape)
    y = z + attn
    return y * jax.nn.sigmoid(y)


if __name__ == "__main__":
    # Small shapes consistent with the module defaults:
    # channels=32 (divisible by norm_group=32), resolution=8, kv_frames=1, num_head=4.
    B, C, R = 2, 32, 8
    S = R * R

    key = jax.random.PRNGKey(0)
    ks = jax.random.split(key, 12)
    params = {
        "q_gamma": 1.0 + 0.1 * jax.random.normal(ks[0], (C,), jnp.float32),
        "q_beta": 0.1 * jax.random.normal(ks[1], (C,), jnp.float32),
        "kv_gamma": 1.0 + 0.1 * jax.random.normal(ks[2], (C,), jnp.float32),
        "kv_beta": 0.1 * jax.random.normal(ks[3], (C,), jnp.float32),
        # (PyTorch initializes the pos embeddings to zero; random here to exercise the add.)
        "q_pos_emb": 0.05 * jax.random.normal(ks[4], (S, C), jnp.float32),
        "kv_pos_emb": 0.05 * jax.random.normal(ks[5], (S, C), jnp.float32),
        "in_proj_weight": 0.05 * jax.random.normal(ks[6], (3 * C, C), jnp.float32),
        "in_proj_bias": 0.01 * jax.random.normal(ks[7], (3 * C,), jnp.float32),
        "out_proj_weight": 0.05 * jax.random.normal(ks[8], (C, C), jnp.float32),
        "out_proj_bias": 0.01 * jax.random.normal(ks[9], (C,), jnp.float32),
    }

    z = jax.random.normal(ks[10], (B, C, R, R), jnp.float32)
    addin = jax.random.normal(ks[11], (B, C, R, R), jnp.float32)

    out = jax.block_until_ready(cross_attention_block(z, addin, params))
    ref = jax.block_until_ready(ref_forward(z, addin, params))

    np.testing.assert_allclose(np.asarray(out), np.asarray(ref), rtol=2e-3, atol=2e-3)
    assert out.shape == z.shape and out.dtype == jnp.float32
    print("KERNEL_OK")
</pallas_src>

<mosaic_0001>
module attributes {stable_mosaic.version = 11 : i64} {
  func.func @cross_attention_kernel(%arg0: i32, %arg1: memref<1x64x32xf32, #tpu.memory_space<vmem>>, %arg2: memref<1x64x32xf32, #tpu.memory_space<vmem>>, %arg3: memref<8x32xf32, #tpu.memory_space<vmem>>, %arg4: memref<64x32xf32, #tpu.memory_space<vmem>>, %arg5: memref<64x32xf32, #tpu.memory_space<vmem>>, %arg6: memref<32x32xf32, #tpu.memory_space<vmem>>, %arg7: memref<32x32xf32, #tpu.memory_space<vmem>>, %arg8: memref<32x128xf32, #tpu.memory_space<vmem>>, %arg9: memref<1x1x2048xf32, #tpu.memory_space<vmem>>) attributes {dimension_semantics = [#tpu.dimension_semantics<parallel>], iteration_bounds = array<i64: 2>, scalar_prefetch = 0 : i64, scratch_operands = 0 : i64, tpu.core_type = #tpu.core_type<tc>, window_params = [{transform_indices = @transform_0, window_bounds = array<i64: 1, 64, 32>}, {transform_indices = @transform_1, window_bounds = array<i64: 1, 64, 32>}, {pipeline_mode = #tpu.pipeline_mode<synchronous>, transform_indices = @transform_2, window_bounds = array<i64: 8, 32>}, {pipeline_mode = #tpu.pipeline_mode<synchronous>, transform_indices = @transform_3, window_bounds = array<i64: 64, 32>}, {pipeline_mode = #tpu.pipeline_mode<synchronous>, transform_indices = @transform_4, window_bounds = array<i64: 64, 32>}, {pipeline_mode = #tpu.pipeline_mode<synchronous>, transform_indices = @transform_5, window_bounds = array<i64: 32, 32>}, {pipeline_mode = #tpu.pipeline_mode<synchronous>, transform_indices = @transform_6, window_bounds = array<i64: 32, 32>}, {pipeline_mode = #tpu.pipeline_mode<synchronous>, transform_indices = @transform_7, window_bounds = array<i64: 32, 128>}, {transform_indices = @transform_8, window_bounds = array<i64: 1, 1, 2048>}]} {
    %c0 = arith.constant 0 : index
    %c0_0 = arith.constant 0 : index
    %c0_1 = arith.constant 0 : index
    %0 = vector.load %arg1[%c0, %c0_0, %c0_1] : memref<1x64x32xf32, #tpu.memory_space<vmem>>, vector<1x64x32xf32>
    %c0_2 = arith.constant 0 : index
    %c0_3 = arith.constant 0 : index
    %c0_4 = arith.constant 0 : index
    %1 = vector.load %arg2[%c0_2, %c0_3, %c0_4] : memref<1x64x32xf32, #tpu.memory_space<vmem>>, vector<1x64x32xf32>
    %c0_5 = arith.constant 0 : index
    %c0_6 = arith.constant 0 : index
    %2 = vector.load %arg3[%c0_5, %c0_6] : memref<8x32xf32, #tpu.memory_space<vmem>>, vector<8x32xf32>
    %3 = vector.extract_strided_slice %2 {offsets = [0, 0], sizes = [1, 32], strides = [1, 1]} : vector<8x32xf32> to vector<1x32xf32>
    %4 = vector.extract_strided_slice %2 {offsets = [1, 0], sizes = [1, 32], strides = [1, 1]} : vector<8x32xf32> to vector<1x32xf32>
    %5 = vector.extract_strided_slice %2 {offsets = [2, 0], sizes = [1, 32], strides = [1, 1]} : vector<8x32xf32> to vector<1x32xf32>
    %6 = vector.extract_strided_slice %2 {offsets = [3, 0], sizes = [1, 32], strides = [1, 1]} : vector<8x32xf32> to vector<1x32xf32>
    %7 = vector.extract_strided_slice %2 {offsets = [4, 0], sizes = [1, 32], strides = [1, 1]} : vector<8x32xf32> to vector<1x32xf32>
    %8 = vector.extract_strided_slice %2 {offsets = [5, 0], sizes = [1, 32], strides = [1, 1]} : vector<8x32xf32> to vector<1x32xf32>
    %9 = vector.extract_strided_slice %2 {offsets = [6, 0], sizes = [1, 32], strides = [1, 1]} : vector<8x32xf32> to vector<1x32xf32>
    %cst = arith.constant dense<0.000000e+00> : vector<1x32xf32>
    %10 = vector.multi_reduction <add>, %0, %cst [1] : vector<1x64x32xf32> to vector<1x32xf32>
    %11 = arith.mulf %0, %0 : vector<1x64x32xf32>
    %cst_7 = arith.constant dense<0.000000e+00> : vector<1x32xf32>
    %12 = vector.multi_reduction <add>, %11, %cst_7 [1] : vector<1x64x32xf32> to vector<1x32xf32>
    %cst_8 = arith.constant 1.562500e-02 : f32
    %13 = vector.broadcast %cst_8 : f32 to vector<1x32xf32>
    %14 = arith.mulf %10, %13 : vector<1x32xf32>
    %cst_9 = arith.constant 1.562500e-02 : f32
    %15 = vector.broadcast %cst_9 : f32 to vector<1x32xf32>
    %16 = arith.mulf %12, %15 : vector<1x32xf32>
    %17 = arith.mulf %14, %14 : vector<1x32xf32>
    %18 = arith.subf %16, %17 : vector<1x32xf32>
    %cst_10 = arith.constant 0.000000e+00 : f32
    %19 = vector.broadcast %cst_10 : f32 to vector<1x32xf32>
    %20 = arith.maximumf %18, %19 : vector<1x32xf32>
    %cst_11 = arith.constant 9.99999974E-6 : f32
    %21 = vector.broadcast %cst_11 : f32 to vector<1x32xf32>
    %22 = arith.addf %20, %21 : vector<1x32xf32>
    %23 = math.rsqrt %22 : vector<1x32xf32>
    %24 = vector.shape_cast %14 : vector<1x32xf32> to vector<1x1x32xf32>
    %25 = vector.broadcast %24 : vector<1x1x32xf32> to vector<1x64x32xf32>
    %26 = arith.subf %0, %25 : vector<1x64x32xf32>
    %27 = vector.shape_cast %23 : vector<1x32xf32> to vector<1x1x32xf32>
    %28 = vector.shape_cast %3 : vector<1x32xf32> to vector<1x1x32xf32>
    %29 = arith.mulf %27, %28 : vector<1x1x32xf32>
    %30 = vector.broadcast %29 : vector<1x1x32xf32> to vector<1x64x32xf32>
    %31 = arith.mulf %26, %30 : vector<1x64x32xf32>
    %32 = vector.shape_cast %4 : vector<1x32xf32> to vector<1x1x32xf32>
    %33 = vector.broadcast %32 : vector<1x1x32xf32> to vector<1x64x32xf32>
    %34 = arith.addf %31, %33 : vector<1x64x32xf32>
    %c0_12 = arith.constant 0 : index
    %c0_13 = arith.constant 0 : index
    %35 = vector.load %arg4[%c0_12, %c0_13] : memref<64x32xf32, #tpu.memory_space<vmem>>, vector<64x32xf32>
    %36 = vector.shape_cast %35 : vector<64x32xf32> to vector<1x64x32xf32>
    %37 = arith.addf %34, %36 : vector<1x64x32xf32>
    %cst_14 = arith.constant dense<0.000000e+00> : vector<1x32xf32>
    %38 = vector.multi_reduction <add>, %1, %cst_14 [1] : vector<1x64x32xf32> to vector<1x32xf32>
    %39 = arith.mulf %1, %1 : vector<1x64x32xf32>
    %cst_15 = arith.constant dense<0.000000e+00> : vector<1x32xf32>
    %40 = vector.multi_reduction <add>, %39, %cst_15 [1] : vector<1x64x32xf32> to vector<1x32xf32>
    %cst_16 = arith.constant 1.562500e-02 : f32
    %41 = vector.broadcast %cst_16 : f32 to vector<1x32xf32>
    %42 = arith.mulf %38, %41 : vector<1x32xf32>
    %cst_17 = arith.constant 1.562500e-02 : f32
    %43 = vector.broadcast %cst_17 : f32 to vector<1x32xf32>
    %44 = arith.mulf %40, %43 : vector<1x32xf32>
    %45 = arith.mulf %42, %42 : vector<1x32xf32>
    %46 = arith.subf %44, %45 : vector<1x32xf32>
    %cst_18 = arith.constant 0.000000e+00 : f32
    %47 = vector.broadcast %cst_18 : f32 to vector<1x32xf32>
    %48 = arith.maximumf %46, %47 : vector<1x32xf32>
    %cst_19 = arith.constant 9.99999974E-6 : f32
    %49 = vector.broadcast %cst_19 : f32 to vector<1x32xf32>
    %50 = arith.addf %48, %49 : vector<1x32xf32>
    %51 = math.rsqrt %50 : vector<1x32xf32>
    %52 = vector.shape_cast %42 : vector<1x32xf32> to vector<1x1x32xf32>
    %53 = vector.broadcast %52 : vector<1x1x32xf32> to vector<1x64x32xf32>
    %54 = arith.subf %1, %53 : vector<1x64x32xf32>
    %55 = vector.shape_cast %51 : vector<1x32xf32> to vector<1x1x32xf32>
    %56 = vector.shape_cast %5 : vector<1x32xf32> to vector<1x1x32xf32>
    %57 = arith.mulf %55, %56 : vector<1x1x32xf32>
    %58 = vector.broadcast %57 : vector<1x1x32xf32> to vector<1x64x32xf32>
    %59 = arith.mulf %54, %58 : vector<1x64x32xf32>
    %60 = vector.shape_cast %6 : vector<1x32xf32> to vector<1x1x32xf32>
    %61 = vector.broadcast %60 : vector<1x1x32xf32> to vector<1x64x32xf32>
    %62 = arith.addf %59, %61 : vector<1x64x32xf32>
    %c0_20 = arith.constant 0 : index
    %c0_21 = arith.constant 0 : index
    %63 = vector.load %arg5[%c0_20, %c0_21] : memref<64x32xf32, #tpu.memory_space<vmem>>, vector<64x32xf32>
    %64 = vector.shape_cast %63 : vector<64x32xf32> to vector<1x64x32xf32>
    %65 = arith.addf %62, %64 : vector<1x64x32xf32>
    %66 = vector.shape_cast %37 : vector<1x64x32xf32> to vector<64x32xf32>
    %67 = vector.shape_cast %65 : vector<1x64x32xf32> to vector<64x32xf32>
    %c0_22 = arith.constant 0 : index
    %c0_23 = arith.constant 0 : index
    %68 = vector.load %arg6[%c0_22, %c0_23] : memref<32x32xf32, #tpu.memory_space<vmem>>, vector<32x32xf32>
    %cst_24 = arith.constant dense<0.000000e+00> : vector<64x32xf32>
    %69 = tpu.matmul %66, %68, %cst_24 {dimension_numbers = #tpu.dot_dimension_numbers<[1], [0], [0], [1], [0, 0, 1, 1], [], []>} : vector<64x32xf32>, vector<32x32xf32>, vector<64x32xf32> -> vector<64x32xf32>
    %70 = vector.broadcast %7 : vector<1x32xf32> to vector<64x32xf32>
    %71 = arith.addf %69, %70 : vector<64x32xf32>
    %72 = vector.shape_cast %71 : vector<64x32xf32> to vector<1x64x32xf32>
    %c0_25 = arith.constant 0 : index
    %c0_26 = arith.constant 0 : index
    %73 = vector.load %arg7[%c0_25, %c0_26] : memref<32x32xf32, #tpu.memory_space<vmem>>, vector<32x32xf32>
    %cst_27 = arith.constant dense<0.000000e+00> : vector<64x32xf32>
    %74 = tpu.matmul %67, %73, %cst_27 {dimension_numbers = #tpu.dot_dimension_numbers<[1], [0], [0], [1], [0, 0, 1, 1], [], []>} : vector<64x32xf32>, vector<32x32xf32>, vector<64x32xf32> -> vector<64x32xf32>
    %75 = vector.broadcast %8 : vector<1x32xf32> to vector<64x32xf32>
    %76 = arith.addf %74, %75 : vector<64x32xf32>
    %77 = vector.shape_cast %76 : vector<64x32xf32> to vector<1x64x32xf32>
    %c0_28 = arith.constant 0 : index
    %c0_29 = arith.constant 0 : index
    %78 = vector.load %arg8[%c0_28, %c0_29] : memref<32x128xf32, #tpu.memory_space<vmem>>, vector<32x128xf32>
    %cst_30 = arith.constant dense<0.000000e+00> : vector<64x128xf32>
    %79 = tpu.matmul %67, %78, %cst_30 {dimension_numbers = #tpu.dot_dimension_numbers<[1], [0], [0], [1], [0, 0, 1, 1], [], []>} : vector<64x32xf32>, vector<32x128xf32>, vector<64x128xf32> -> vector<64x128xf32>
    %80 = vector.shape_cast %79 : vector<64x128xf32> to vector<1x64x128xf32>
    %cst_31 = arith.constant 0.000000e+00 : f32
    %81 = vector.broadcast %cst_31 : f32 to vector<1x64x32xf32>
    %82 = vector.extract_strided_slice %72 {offsets = [0, 0, 0], sizes = [1, 64, 8], strides = [1, 1, 1]} : vector<1x64x32xf32> to vector<1x64x8xf32>
    %83 = vector.extract_strided_slice %77 {offsets = [0, 0, 0], sizes = [1, 64, 8], strides = [1, 1, 1]} : vector<1x64x32xf32> to vector<1x64x8xf32>
    %84 = vector.extract_strided_slice %80 {offsets = [0, 0, 0], sizes = [1, 64, 32], strides = [1, 1, 1]} : vector<1x64x128xf32> to vector<1x64x32xf32>
    "tpu.trace_start"() <{level = 10 : i32, message = "bqd,bkd->bqk"}> : () -> ()
    %cst_32 = arith.constant dense<0.000000e+00> : vector<1x64x64xf32>
    %85 = tpu.matmul %82, %83, %cst_32 {dimension_numbers = #tpu.dot_dimension_numbers<[2], [2], [1], [1], [0, 0, 0, 1, 1, 1], [0], [0]>} : vector<1x64x8xf32>, vector<1x64x8xf32>, vector<1x64x64xf32> -> vector<1x64x64xf32>
    "tpu.trace_stop"() : () -> ()
    %cst_33 = arith.constant dense<0xFF800000> : vector<1x64xf32>
    %86 = vector.multi_reduction <maximumf>, %85, %cst_33 [2] : vector<1x64x64xf32> to vector<1x64xf32>
    %87 = vector.shape_cast %86 : vector<1x64xf32> to vector<1x64x1xf32>
    %88 = vector.broadcast %87 : vector<1x64x1xf32> to vector<1x64x64xf32>
    %89 = arith.subf %85, %88 : vector<1x64x64xf32>
    %90 = math.exp %89 : vector<1x64x64xf32>
    %cst_34 = arith.constant dense<0.000000e+00> : vector<1x64xf32>
    %91 = vector.multi_reduction <add>, %90, %cst_34 [2] : vector<1x64x64xf32> to vector<1x64xf32>
    %92 = vector.shape_cast %91 : vector<1x64xf32> to vector<1x64x1xf32>
    %93 = tpu.reciprocal %92 {approx = true} : vector<1x64x1xf32> -> vector<1x64x1xf32>
    %94 = vector.broadcast %93 : vector<1x64x1xf32> to vector<1x64x64xf32>
    %95 = arith.mulf %90, %94 : vector<1x64x64xf32>
    "tpu.trace_start"() <{level = 10 : i32, message = "bqk,bkc->bqc"}> : () -> ()
    %cst_35 = arith.constant dense<0.000000e+00> : vector<1x64x32xf32>
    %96 = tpu.matmul %95, %84, %cst_35 {dimension_numbers = #tpu.dot_dimension_numbers<[2], [1], [1], [2], [0, 0, 0, 1, 1, 2], [0], [0]>} : vector<1x64x64xf32>, vector<1x64x32xf32>, vector<1x64x32xf32> -> vector<1x64x32xf32>
    "tpu.trace_stop"() : () -> ()
    %97 = arith.addf %81, %96 : vector<1x64x32xf32>
    %98 = vector.extract_strided_slice %72 {offsets = [0, 0, 8], sizes = [1, 64, 8], strides = [1, 1, 1]} : vector<1x64x32xf32> to vector<1x64x8xf32>
    %99 = vector.extract_strided_slice %77 {offsets = [0, 0, 8], sizes = [1, 64, 8], strides = [1, 1, 1]} : vector<1x64x32xf32> to vector<1x64x8xf32>
    %100 = vector.extract_strided_slice %80 {offsets = [0, 0, 32], sizes = [1, 64, 32], strides = [1, 1, 1]} : vector<1x64x128xf32> to vector<1x64x32xf32>
    "tpu.trace_start"() <{level = 10 : i32, message = "bqd,bkd->bqk"}> : () -> ()
    %cst_36 = arith.constant dense<0.000000e+00> : vector<1x64x64xf32>
    %101 = tpu.matmul %98, %99, %cst_36 {dimension_numbers = #tpu.dot_dimension_numbers<[2], [2], [1], [1], [0, 0, 0, 1, 1, 1], [0], [0]>} : vector<1x64x8xf32>, vector<1x64x8xf32>, vector<1x64x64xf32> -> vector<1x64x64xf32>
    "tpu.trace_stop"() : () -> ()
    %cst_37 = arith.constant dense<0xFF800000> : vector<1x64xf32>
    %102 = vector.multi_reduction <maximumf>, %101, %cst_37 [2] : vector<1x64x64xf32> to vector<1x64xf32>
    %103 = vector.shape_cast %102 : vector<1x64xf32> to vector<1x64x1xf32>
    %104 = vector.broadcast %103 : vector<1x64x1xf32> to vector<1x64x64xf32>
    %105 = arith.subf %101, %104 : vector<1x64x64xf32>
    %106 = math.exp %105 : vector<1x64x64xf32>
    %cst_38 = arith.constant dense<0.000000e+00> : vector<1x64xf32>
    %107 = vector.multi_reduction <add>, %106, %cst_38 [2] : vector<1x64x64xf32> to vector<1x64xf32>
    %108 = vector.shape_cast %107 : vector<1x64xf32> to vector<1x64x1xf32>
    %109 = tpu.reciprocal %108 {approx = true} : vector<1x64x1xf32> -> vector<1x64x1xf32>
    %110 = vector.broadcast %109 : vector<1x64x1xf32> to vector<1x64x64xf32>
    %111 = arith.mulf %106, %110 : vector<1x64x64xf32>
    "tpu.trace_start"() <{level = 10 : i32, message = "bqk,bkc->bqc"}> : () -> ()
    %cst_39 = arith.constant dense<0.000000e+00> : vector<1x64x32xf32>
    %112 = tpu.matmul %111, %100, %cst_39 {dimension_numbers = #tpu.dot_dimension_numbers<[2], [1], [1], [2], [0, 0, 0, 1, 1, 2], [0], [0]>} : vector<1x64x64xf32>, vector<1x64x32xf32>, vector<1x64x32xf32> -> vector<1x64x32xf32>
    "tpu.trace_stop"() : () -> ()
    %113 = arith.addf %97, %112 : vector<1x64x32xf32>
    %114 = vector.extract_strided_slice %72 {offsets = [0, 0, 16], sizes = [1, 64, 8], strides = [1, 1, 1]} : vector<1x64x32xf32> to vector<1x64x8xf32>
    %115 = vector.extract_strided_slice %77 {offsets = [0, 0, 16], sizes = [1, 64, 8], strides = [1, 1, 1]} : vector<1x64x32xf32> to vector<1x64x8xf32>
    %116 = vector.extract_strided_slice %80 {offsets = [0, 0, 64], sizes = [1, 64, 32], strides = [1, 1, 1]} : vector<1x64x128xf32> to vector<1x64x32xf32>
    "tpu.trace_start"() <{level = 10 : i32, message = "bqd,bkd->bqk"}> : () -> ()
    %cst_40 = arith.constant dense<0.000000e+00> : vector<1x64x64xf32>
    %117 = tpu.matmul %114, %115, %cst_40 {dimension_numbers = #tpu.dot_dimension_numbers<[2], [2], [1], [1], [0, 0, 0, 1, 1, 1], [0], [0]>} : vector<1x64x8xf32>, vector<1x64x8xf32>, vector<1x64x64xf32> -> vector<1x64x64xf32>
    "tpu.trace_stop"() : () -> ()
    %cst_41 = arith.constant dense<0xFF800000> : vector<1x64xf32>
    %118 = vector.multi_reduction <maximumf>, %117, %cst_41 [2] : vector<1x64x64xf32> to vector<1x64xf32>
    %119 = vector.shape_cast %118 : vector<1x64xf32> to vector<1x64x1xf32>
    %120 = vector.broadcast %119 : vector<1x64x1xf32> to vector<1x64x64xf32>
    %121 = arith.subf %117, %120 : vector<1x64x64xf32>
    %122 = math.exp %121 : vector<1x64x64xf32>
    %cst_42 = arith.constant dense<0.000000e+00> : vector<1x64xf32>
    %123 = vector.multi_reduction <add>, %122, %cst_42 [2] : vector<1x64x64xf32> to vector<1x64xf32>
    %124 = vector.shape_cast %123 : vector<1x64xf32> to vector<1x64x1xf32>
    %125 = tpu.reciprocal %124 {approx = true} : vector<1x64x1xf32> -> vector<1x64x1xf32>
    %126 = vector.broadcast %125 : vector<1x64x1xf32> to vector<1x64x64xf32>
    %127 = arith.mulf %122, %126 : vector<1x64x64xf32>
    "tpu.trace_start"() <{level = 10 : i32, message = "bqk,bkc->bqc"}> : () -> ()
    %cst_43 = arith.constant dense<0.000000e+00> : vector<1x64x32xf32>
    %128 = tpu.matmul %127, %116, %cst_43 {dimension_numbers = #tpu.dot_dimension_numbers<[2], [1], [1], [2], [0, 0, 0, 1, 1, 2], [0], [0]>} : vector<1x64x64xf32>, vector<1x64x32xf32>, vector<1x64x32xf32> -> vector<1x64x32xf32>
    "tpu.trace_stop"() : () -> ()
    %129 = arith.addf %113, %128 : vector<1x64x32xf32>
    %130 = vector.extract_strided_slice %72 {offsets = [0, 0, 24], sizes = [1, 64, 8], strides = [1, 1, 1]} : vector<1x64x32xf32> to vector<1x64x8xf32>
    %131 = vector.extract_strided_slice %77 {offsets = [0, 0, 24], sizes = [1, 64, 8], strides = [1, 1, 1]} : vector<1x64x32xf32> to vector<1x64x8xf32>
    %132 = vector.extract_strided_slice %80 {offsets = [0, 0, 96], sizes = [1, 64, 32], strides = [1, 1, 1]} : vector<1x64x128xf32> to vector<1x64x32xf32>
    "tpu.trace_start"() <{level = 10 : i32, message = "bqd,bkd->bqk"}> : () -> ()
    %cst_44 = arith.constant dense<0.000000e+00> : vector<1x64x64xf32>
    %133 = tpu.matmul %130, %131, %cst_44 {dimension_numbers = #tpu.dot_dimension_numbers<[2], [2], [1], [1], [0, 0, 0, 1, 1, 1], [0], [0]>} : vector<1x64x8xf32>, vector<1x64x8xf32>, vector<1x64x64xf32> -> vector<1x64x64xf32>
    "tpu.trace_stop"() : () -> ()
    %cst_45 = arith.constant dense<0xFF800000> : vector<1x64xf32>
    %134 = vector.multi_reduction <maximumf>, %133, %cst_45 [2] : vector<1x64x64xf32> to vector<1x64xf32>
    %135 = vector.shape_cast %134 : vector<1x64xf32> to vector<1x64x1xf32>
    %136 = vector.broadcast %135 : vector<1x64x1xf32> to vector<1x64x64xf32>
    %137 = arith.subf %133, %136 : vector<1x64x64xf32>
    %138 = math.exp %137 : vector<1x64x64xf32>
    %cst_46 = arith.constant dense<0.000000e+00> : vector<1x64xf32>
    %139 = vector.multi_reduction <add>, %138, %cst_46 [2] : vector<1x64x64xf32> to vector<1x64xf32>
    %140 = vector.shape_cast %139 : vector<1x64xf32> to vector<1x64x1xf32>
    %141 = tpu.reciprocal %140 {approx = true} : vector<1x64x1xf32> -> vector<1x64x1xf32>
    %142 = vector.broadcast %141 : vector<1x64x1xf32> to vector<1x64x64xf32>
    %143 = arith.mulf %138, %142 : vector<1x64x64xf32>
    "tpu.trace_start"() <{level = 10 : i32, message = "bqk,bkc->bqc"}> : () -> ()
    %cst_47 = arith.constant dense<0.000000e+00> : vector<1x64x32xf32>
    %144 = tpu.matmul %143, %132, %cst_47 {dimension_numbers = #tpu.dot_dimension_numbers<[2], [1], [1], [2], [0, 0, 0, 1, 1, 2], [0], [0]>} : vector<1x64x64xf32>, vector<1x64x32xf32>, vector<1x64x32xf32> -> vector<1x64x32xf32>
    "tpu.trace_stop"() : () -> ()
    %145 = arith.addf %129, %144 : vector<1x64x32xf32>
    %146 = arith.addf %0, %145 : vector<1x64x32xf32>
    %147 = vector.shape_cast %9 : vector<1x32xf32> to vector<1x1x32xf32>
    %148 = vector.broadcast %147 : vector<1x1x32xf32> to vector<1x64x32xf32>
    %149 = arith.addf %146, %148 : vector<1x64x32xf32>
    %150 = arith.negf %149 : vector<1x64x32xf32>
    %151 = math.exp %150 : vector<1x64x32xf32>
    %cst_48 = arith.constant 1.000000e+00 : f32
    %152 = vector.broadcast %cst_48 : f32 to vector<1x64x32xf32>
    %153 = arith.addf %152, %151 : vector<1x64x32xf32>
    %154 = arith.divf %152, %153 : vector<1x64x32xf32>
    %155 = arith.mulf %149, %154 : vector<1x64x32xf32>
    %156 = vector.shape_cast %155 : vector<1x64x32xf32> to vector<1x1x2048xf32>
    %c0_49 = arith.constant 0 : index
    %c0_50 = arith.constant 0 : index
    %c0_51 = arith.constant 0 : index
    %157 = vector.load %arg9[%c0_49, %c0_50, %c0_51] : memref<1x1x2048xf32, #tpu.memory_space<vmem>>, vector<1x1x2048xf32>
    tpu.vector_store %arg9[%c0_49, %c0_50, %c0_51], %156 {strides = array<i32>} : memref<1x1x2048xf32, #tpu.memory_space<vmem>>, vector<1x1x2048xf32>,
    return
  }
  func.func @transform_0(%arg0: i32) -> (i32, i32, i32) {
    %c0_i32 = arith.constant 0 : i32
    %c0_i32_0 = arith.constant 0 : i32
    %c0_i32_1 = arith.constant 0 : i32
    return %arg0, %c0_i32, %c0_i32_0 : i32, i32, i32
  }
  func.func @transform_1(%arg0: i32) -> (i32, i32, i32) {
    %c0_i32 = arith.constant 0 : i32
    %c0_i32_0 = arith.constant 0 : i32
    %c0_i32_1 = arith.constant 0 : i32
    return %arg0, %c0_i32, %c0_i32_0 : i32, i32, i32
  }
  func.func @transform_2(%arg0: i32) -> (i32, i32) {
    %c0_i32 = arith.constant 0 : i32
    %c0_i32_0 = arith.constant 0 : i32
    %c0_i32_1 = arith.constant 0 : i32
    return %c0_i32, %c0_i32_0 : i32, i32
  }
  func.func @transform_3(%arg0: i32) -> (i32, i32) {
    %c0_i32 = arith.constant 0 : i32
    %c0_i32_0 = arith.constant 0 : i32
    %c0_i32_1 = arith.constant 0 : i32
    return %c0_i32, %c0_i32_0 : i32, i32
  }
  func.func @transform_4(%arg0: i32) -> (i32, i32) {
    %c0_i32 = arith.constant 0 : i32
    %c0_i32_0 = arith.constant 0 : i32
    %c0_i32_1 = arith.constant 0 : i32
    return %c0_i32, %c0_i32_0 : i32, i32
  }
  func.func @transform_5(%arg0: i32) -> (i32, i32) {
    %c0_i32 = arith.constant 0 : i32
    %c0_i32_0 = arith.constant 0 : i32
    %c0_i32_1 = arith.constant 0 : i32
    return %c0_i32, %c0_i32_0 : i32, i32
  }
  func.func @transform_6(%arg0: i32) -> (i32, i32) {
    %c0_i32 = arith.constant 0 : i32
    %c0_i32_0 = arith.constant 0 : i32
    %c0_i32_1 = arith.constant 0 : i32
    return %c0_i32, %c0_i32_0 : i32, i32
  }
  func.func @transform_7(%arg0: i32) -> (i32, i32) {
    %c0_i32 = arith.constant 0 : i32
    %c0_i32_0 = arith.constant 0 : i32
    %c0_i32_1 = arith.constant 0 : i32
    return %c0_i32, %c0_i32_0 : i32, i32
  }
  func.func @transform_8(%arg0: i32) -> (i32, i32, i32) {
    %c0_i32 = arith.constant 0 : i32
    %c0_i32_0 = arith.constant 0 : i32
    %c0_i32_1 = arith.constant 0 : i32
    return %arg0, %c0_i32, %c0_i32_0 : i32, i32, i32
  }
}

</mosaic_0001>

<bundles_post_ra>
// kernel: tpu_custom_call.1
= control target key start
LH: loop header
LB: loop body
LE: loop exit
PB: predicated region body
PF: predicated region fallthrough
CT: control target
= control target key end

     0   :  { %13 = vsyncpa [#allocation3], 0  ;;  %s5917_s0 = inlined_call_operand.vmem [shape: f32[2,64,32], index: 0, kind: input, shape index: {}]   ;;  %s5918_s1 = inlined_call_operand.vmem [shape: f32[2,64,32], index: 1, kind: input, shape index: {}]   ;;  %s5919_s2 = inlined_call_operand.vmem [shape: f32[8,32], index: 2, kind: input, shape index: {}]   ;;  %s5920_s3 = inlined_call_operand.vmem [shape: f32[64,32], index: 3, kind: input, shape index: {}]   ;;  %s5921_s4 = inlined_call_operand.vmem [shape: f32[64,32], index: 4, kind: input, shape index: {}]   ;;  %s5922_s5 = inlined_call_operand.vmem [shape: f32[32,32], index: 5, kind: input, shape index: {}]   ;;  %s5923_s6 = inlined_call_operand.vmem [shape: f32[32,32], index: 6, kind: input, shape index: {}]   ;;  %s5924_s7 = inlined_call_operand.vmem [shape: f32[32,128], index: 7, kind: input, shape index: {}]   ;;  %s5925_s8 = inlined_call_operand.hbm [shape: f32[2,1,2048], index: 8, kind: output, shape index: {}]  }
   0x1   :  { %15 = vsyncpa [#allocation3 + $0x1], 0  ;;  %s4417_s27 = smov 0   ;;  %s4419_s28 = smov 0  }
   0x2   :  { %s4421_s29 = smov 0   ;;  %s4423_s30 = smov 0  }
   0x3 LB: > { %s4438_s9 = sadd.s32 4294967295, %s4359_s30   ;;  %s3476_s10 = sadd.s32 4294967294, %s4359_s30   ;;  %s4359_s30 = sphi %s4423_s30, %s5931_s30   ;;  %s4355_s29 = sphi %s4421_s29, %s5930_s29   ;;  %s4351_s28 = sphi %s4419_s28, %s5929_s28   ;;  %s4347_s27 = sphi %s4417_s27, %s5928_s27  }
   0x4   : > { %s4442_s11 = sadd.s32 1, %s4359_s30   ;;  %s206_s12 = sadd.s32 1, %s4355_s29 }
   0x5   : > { %s203_s13 = ssub.s32 %s4359_s30, %s4442_s11  ;;  %p216_p0 = scmp.ne.s32.totalorder %s4355_s29, %s4351_s28 }
   0x6   : > { %p204_p1 = scmp.eq.s32.totalorder %s203_s13, 0  ;;  %p217_p2 = scmp.eq.s32.totalorder %s4438_s9, 1 }
   0x7   : > { %p222_p3 = scmp.ne.s32.totalorder %s4351_s28, %s4347_s27  ;;  %p223_p4 = scmp.eq.s32.totalorder %s3476_s10, 1 }
   0x8   : > { %s4453_s14 = scalar_select %p204_p1, %s4355_s29, %s206_s12  }
   0x9   : > { %p4455_p5 = por %p217_p2, %p216_p0  ;;  %p4459_p6 = por %p223_p4, %p222_p3 }
   0xa   : > { %p3479_p7 = scmp.ge.s32.totalorder %s4359_s30, 1  ;;  %p275_p8 = scmp.lt.s32.totalorder %s4359_s30, 3 }
   0xc   : > { %p276_p9 = pnand %p3479_p7, %p275_p8 }
   0xd   : > { %p314_p10 = scmp.lt.s32.totalorder (!%p276_p9), %s4438_s9, 1  ;;  %s4361_s22 = smov (!%p276_p9), 120  }
   0xe   : > { %279 = sbr.rel (%p276_p9) target bundleno = 2628 (0xa44), region = 52  ;;  %s4363_s24 = smov (!%p276_p9), 112  }
   0xf   : > { %s4364_s25 = smov (!%p276_p9), 64   ;;  %s4366_s10 = smov (!%p276_p9), 32  }
  0x10   : > { %s3620_s20 = sshll.u32 (!%p276_p9), %s4438_s9, 8 }
  0x13   : > { %v557_v0 = vld [vmem:[%s5922_s5 + $0x18] sm:$0xff]  ;;  %v556_v1 = vld [vmem:[%s5922_s5 + $0x10] sm:$0xff]  ;;  %v555_v2 = vld [vmem:[%s5922_s5 + $0x8] sm:$0xff]  ;;  %s315_s23 = scalar_select %p314_p10, %s4438_s9, 1  ;;  %vm341_vm0 = vcmask 261120   ;;  %vm937_vm1 = vcmask 64512  }
  0x14   : > { %4069 = vmatprep.subr.mxu1 %v557_v0  ;;  %3785 = vmatprep.subr.mxu0 %v557_v0  ;;  %v554_v3 = vld [vmem:[%s5922_s5] sm:$0xff]  ;;  %v4487_v4 = vld [vmem:[%s5923_s6 + $0x18] sm:$0xff]  ;;  %vm1091_vm2 = vcmask 523264   ;;  %vm3225_vm3 = vcmask 785408   ;;  %s4371_s9 = smov [#allocation2]  }
  0x15   : > { %4073 = vmatpush3.msra.mxu1 %v557_v0  ;;  %3786 = vmatpush3.msra.mxu0 %v557_v0  ;;  %s3618_s26 = sshll.u32 %s315_s23, 6  ;;  %v4566_v39 = vld [vmem:[%s5924_s7 + $0x18] sm:$0xff]  ;;  %s4362_s23 = smov 96  }
  0x16   : > { %4070 = vmatprep.subr.mxu1 %v556_v1  ;;  %3787 = vmatprep.subr.mxu0 %v556_v1  ;;  %s4482_s13 = scalar_lea.vmem %s5917_s0, %s3618_s26  ;;  %s4512_s21 = scalar_lea.vmem %s5918_s1, %s3618_s26 }
  0x17   : > { %4074 = vmatpush3.msra.mxu1 %v556_v1  ;;  %3788 = vmatpush3.msra.mxu0 %v556_v1  ;;  %v4490_v5 = vld [vmem:[%s4482_s13] sm:$0xff]  ;;  %v4493_v6 = vld [vmem:[%s4482_s13 + $0x8] sm:$0xff]  ;;  %v4496_v7 = vld [vmem:[%s4482_s13 + $0x10] sm:$0xff]  ;;  %s4365_s26 = smov 104  }
  0x18   : > { %4071 = vmatprep.subr.mxu1 %v555_v2  ;;  %3789 = vmatprep.subr.mxu0 %v555_v2  ;;  %v4499_v8 = vld [vmem:[%s4482_s13 + $0x18] sm:$0xff]  ;;  %v342_v9 = vsel %vm341_vm0, %v4490_v5, 0.0  ;;  %v343_v10 = vsel %vm341_vm0, %v4493_v6, 0.0  ;;  %v345_v11 = vsel %vm341_vm0, %v4496_v7, 0.0  ;;  %v363_v12 = vmul.f32 %v4490_v5, %v4490_v5  ;;  %v4515_v13 = vld [vmem:[%s4482_s13 + $0x20] sm:$0xff]  ;;  %v4518_v15 = vld [vmem:[%s4482_s13 + $0x28] sm:$0xff] }
  0x19   : > { %4075 = vmatpush3.msra.mxu1 %v555_v2  ;;  %3790 = vmatpush3.msra.mxu0 %v555_v2  ;;  %v344_v14 = vadd.f32 %v343_v10, %v342_v9  ;;  %v347_v16 = vsel %vm341_vm0, %v4499_v8, 0.0  ;;  %v364_v17 = vmul.f32 %v4493_v6, %v4493_v6  ;;  %v365_v18 = vmul.f32 %v4496_v7, %v4496_v7  ;;  %v4528_v19 = vld [vmem:[%s4482_s13 + $0x30] sm:$0xff]  ;;  %v4539_v26 = vld [vmem:[%s4512_s21] sm:$0xff]  ;;  %v4542_v27 = vld [vmem:[%s4512_s21 + $0x8] sm:$0xff] }
  0x1a   : > { %4072 = vmatprep.subr.mxu1 %v554_v3  ;;  %3791 = vmatprep.subr.mxu0 %v554_v3  ;;  %v366_v21 = vmul.f32 %v4499_v8, %v4499_v8  ;;  %v349_v22 = vsel %vm341_vm0, %v4515_v13, 0.0  ;;  %v367_v23 = vmul.f32 %v4515_v13, %v4515_v13  ;;  %v371_v24 = vsel %vm341_vm0, %v363_v12, 0.0  ;;  %v4545_v28 = vld [vmem:[%s4482_s13 + $0x38] sm:$0xff]  ;;  %v4551_v33 = vld [vmem:[%s4512_s21 + $0x10] sm:$0xff]  ;;  %v4577_v46 = vld [vmem:[%s4512_s21 + $0x20] sm:$0xff] }
  0x1b   : > { %4076 = vmatpush3.msra.mxu1 %v554_v3  ;;  %3792 = vmatpush3.msra.mxu0 %v554_v3  ;;  %v346_v20 = vadd.f32 %v345_v11, %v344_v14  ;;  %v372_v25 = vsel %vm341_vm0, %v364_v17, 0.0  ;;  %v351_v30 = vsel %vm341_vm0, %v4518_v15, 0.0  ;;  %v374_v32 = vsel %vm341_vm0, %v365_v18, 0.0  ;;  %v4561_v38 = vld [vmem:[%s4512_s21 + $0x18] sm:$0xff]  ;;  %v4587_v54 = vld [vmem:[%s4512_s21 + $0x28] sm:$0xff]  ;;  %v4600_v0 = vld [vmem:[%s4512_s21 + $0x30] sm:$0xff] }
  0x1c   : > { %3805 = vmatprep.subr.mxu1 %v4487_v4  ;;  %v373_v31 = vadd.f32 %v372_v25, %v371_v24  ;;  %v353_v34 = vsel %vm341_vm0, %v4528_v19, 0.0  ;;  %v368_v35 = vmul.f32 %v4518_v15, %v4518_v15  ;;  %v369_v36 = vmul.f32 %v4528_v19, %v4528_v19  ;;  %3825 = vmatprep.subr.mxu0 %v4566_v39  ;;  %v4608_v12 = vld [vmem:[%s4512_s21 + $0x38] sm:$0xff] }
  0x1d   : > { %v348_v29 = vadd.f32 %v347_v16, %v346_v20  ;;  %v376_v37 = vsel %vm341_vm0, %v366_v21, 0.0  ;;  %v448_v42 = vsel %vm341_vm0, %v4539_v26, 0.0  ;;  %v449_v43 = vsel %vm341_vm0, %v4542_v27, 0.0 }
  0x1e   : > { %v375_v41 = vadd.f32 %v374_v32, %v373_v31  ;;  %v370_v44 = vmul.f32 %v4545_v28, %v4545_v28  ;;  %v378_v45 = vsel %vm341_vm0, %v367_v23, 0.0  ;;  %v450_v47 = vadd.f32 %v449_v43, %v448_v42 }
  0x1f   : > { %v350_v40 = vadd.f32 %v349_v22, %v348_v29  ;;  %v451_v48 = vsel %vm341_vm0, %v4551_v33, 0.0  ;;  %v355_v50 = vsel %vm341_vm0, %v4545_v28, 0.0  ;;  %v453_v52 = vsel %vm341_vm0, %v4561_v38, 0.0 }
  0x20   : > { %v377_v51 = vadd.f32 %v376_v37, %v375_v41  ;;  %v380_v53 = vsel %vm341_vm0, %v368_v35, 0.0  ;;  %v452_v55 = vadd.f32 %v451_v48, %v450_v47  ;;  %v469_v56 = vmul.f32 %v4539_v26, %v4539_v26 }
  0x21   : > { %v352_v49 = vadd.f32 %v351_v30, %v350_v40  ;;  %v470_v57 = vmul.f32 %v4542_v27, %v4542_v27  ;;  %v455_v60 = vsel %vm341_vm0, %v4577_v46, 0.0  ;;  %v471_v61 = vmul.f32 %v4551_v33, %v4551_v33 }
  0x22   : > { %v379_v59 = vadd.f32 %v378_v45, %v377_v51  ;;  %v382_v62 = vsel %vm341_vm0, %v369_v36, 0.0  ;;  %v384_v63 = vsel %vm341_vm0, %v370_v44, 0.0  ;;  %v454_v1 = vadd.f32 %v453_v52, %v452_v55 }
  0x23   : > { %v354_v58 = vadd.f32 %v353_v34, %v352_v49  ;;  %v472_v2 = vmul.f32 %v4561_v38, %v4561_v38  ;;  %v457_v10 = vsel %vm341_vm0, %v4587_v54, 0.0  ;;  %v477_v11 = vsel %vm341_vm0, %v469_v56, 0.0 }
  0x24   : > { %v381_v9 = vadd.f32 %v380_v53, %v379_v59  ;;  %v456_v14 = vadd.f32 %v455_v60, %v454_v1  ;;  %v473_v16 = vmul.f32 %v4577_v46, %v4577_v46  ;;  %v478_v17 = vsel %vm341_vm0, %v470_v57, 0.0 }
  0x25   : > { %v356_v3 = vadd.f32 %v355_v50, %v354_v58  ;;  %v480_v18 = vsel %vm341_vm0, %v471_v61, 0.0  ;;  %v459_v22 = vsel %vm341_vm0, %v4600_v0, 0.0  ;;  %v479_v23 = vadd.f32 %v478_v17, %v477_v11 }
  0x26   : > { %v383_v21 = vadd.f32 %v382_v62, %v381_v9  ;;  %v458_v24 = vadd.f32 %v457_v10, %v456_v14  ;;  %v474_v25 = vmul.f32 %v4587_v54, %v4587_v54  ;;  %v482_v29 = vsel %vm341_vm0, %v472_v2, 0.0 }
  0x27   : > { %v357_v20 = vrot.slane %v356_v3, 4  ;;  %v461_v32 = vsel %vm341_vm0, %v4608_v12, 0.0  ;;  %v481_v34 = vadd.f32 %v480_v18, %v479_v23  ;;  %v475_v36 = vmul.f32 %v4600_v0, %v4600_v0 }
  0x28   : > { %v385_v31 = vadd.f32 %v384_v63, %v383_v21  ;;  %v460_v35 = vadd.f32 %v459_v22, %v458_v24  ;;  %v484_v37 = vsel %vm341_vm0, %v473_v16, 0.0  ;;  %v476_v44 = vmul.f32 %v4608_v12, %v4608_v12 }
  0x29   : > { %v358_v30 = vadd.f32 %v357_v20, %v356_v3  ;;  %v483_v42 = vadd.f32 %v482_v29, %v481_v34  ;;  %v486_v45 = vsel %vm341_vm0, %v474_v25, 0.0  ;;  %v488_v51 = vsel %vm341_vm0, %v475_v36, 0.0 }
  0x2a   : > { %v386_v41 = vrot.slane %v385_v31, 4  ;;  %v462_v43 = vadd.f32 %v461_v32, %v460_v35  ;;  %v490_v57 = vsel %vm341_vm0, %v476_v44, 0.0  ;;  %v408_v32 = vlaneseq }
  0x2b   : > { %v359_v40 = vrot.slane %v358_v30, 2  ;;  %v485_v49 = vadd.f32 %v484_v37, %v483_v42 }
  0x2c   : > { %v387_v48 = vadd.f32 %v386_v41, %v385_v31  ;;  %v463_v50 = vrot.slane %v462_v43, 4  ;;  %v4637_v36 = vshrl.u32 %v408_v32, 7 }
  0x2d   : > { %v360_v47 = vadd.f32 %v359_v40, %v358_v30  ;;  %v487_v55 = vadd.f32 %v486_v45, %v485_v49  ;;  %v4642_v40 = vld [vmem:[%s5919_s2] sm:$0xff] }
  0x2e   : > { %v388_v53 = vrot.slane %v387_v48, 2  ;;  %v464_v56 = vadd.f32 %v463_v50, %v462_v43  ;;  %v410_v41 = vsub.s32 0, %v4637_v36  ;;  %v422_v42 = vsub.s32 1, %v4637_v36 }
  0x2f   : > { %v361_v52 = vrot.slane %v360_v47, 1  ;;  %v489_v60 = vadd.f32 %v488_v51, %v487_v55 }
  0x30   : > { %v389_v59 = vadd.f32 %v388_v53, %v387_v48  ;;  %v465_v61 = vrot.slane %v464_v56, 2 }
  0x31   : > { %v362_v58 = vadd.f32 %v361_v52, %v360_v47  ;;  %v491_v1 = vadd.f32 %v490_v57, %v489_v60 }
  0x32   : > { %v390_v62 = vrot.slane %v389_v59, 1  ;;  %v466_v2 = vadd.f32 %v465_v61, %v464_v56  ;;  %v432_v61 = vld [vmem:[%s5920_s3] sm:$0xff] }
  0x33   : > { %v4629_v63 = vmul.f32 0.015625, %v362_v58  ;;  %v492_v11 = vrot.slane %v491_v1, 4 }
  0x34   : > { %v391_v3 = vadd.f32 %v390_v62, %v389_v59  ;;  %v467_v10 = vrot.slane %v466_v2, 1  ;;  %v433_v62 = vld [vmem:[%s5920_s3 + $0x8] sm:$0xff] }
  0x35   : > { %v394_v9 = vmul.f32 %v4629_v63, %v4629_v63  ;;  %v493_v17 = vadd.f32 %v492_v11, %v491_v1  ;;  %v403_v44 = vsub.f32 %v4515_v13, %v4629_v63  ;;  %v404_v47 = vsub.f32 %v4518_v15, %v4629_v63 }
  0x36   : > { %v393_v14 = vmul.f32 0.015625, %v391_v3  ;;  %v468_v16 = vadd.f32 %v467_v10, %v466_v2  ;;  %v405_v48 = vsub.f32 %v4528_v19, %v4629_v63  ;;  %v406_v49 = vsub.f32 %v4545_v28, %v4629_v63  ;;  %v436_v19 = vld [vmem:[%s5920_s3 + $0x20] sm:$0xff] }
  0x37   : > { %v494_v20 = vrot.slane %v493_v17, 2  ;;  %v399_v50 = vsub.f32 %v4490_v5, %v4629_v63  ;;  %v400_v51 = vsub.f32 %v4493_v6, %v4629_v63  ;;  %v423_v13 = vrot.slane %v4642_v40, %v422_v42  ;;  %v437_v5 = vld [vmem:[%s5920_s3 + $0x28] sm:$0xff]  ;;  %v438_v6 = vld [vmem:[%s5920_s3 + $0x30] sm:$0xff] }
  0x38   : > { %v395_v18 = vsub.f32 %v393_v14, %v394_v9  ;;  %v4633_v23 = vmul.f32 0.015625, %v468_v16  ;;  %v401_v53 = vsub.f32 %v4496_v7, %v4629_v63  ;;  %v402_v1 = vsub.f32 %v4499_v8, %v4629_v63  ;;  %v439_v16 = vld [vmem:[%s5920_s3 + $0x38] sm:$0xff]  ;;  %v693_v8 = vld [vmem:[%s5923_s6 + $0x10] sm:$0xff] }
  0x39   : > { %v495_v22 = vadd.f32 %v494_v20, %v493_v17  ;;  %v528_v20 = vsub.s32 3, %v4637_v36 }
  0x3a   : > { %v396_v21 = vmax.f32 %v395_v18, 0.0  ;;  %v500_v30 = vmul.f32 %v4633_v23, %v4633_v23  ;;  %v516_v18 = vsub.s32 2, %v4637_v36  ;;  %v505_v63 = vsub.f32 %v4539_v26, %v4633_v23  ;;  %v692_v26 = vld [vmem:[%s5923_s6 + $0x8] sm:$0xff] }
  0x3b   : > { %v496_v25 = vrot.slane %v495_v22, 1  ;;  %v507_v32 = vsub.f32 %v4551_v33, %v4633_v23  ;;  %v529_v33 = vrot.slane %v4642_v40, %v528_v20 }
  0x3c   : > { %v397_v24 = vadd.f32 1e-05, %v396_v21 }
  0x3d   : > { %v497_v29 = vadd.f32 %v496_v25, %v495_v22  ;;  %v506_v25 = vsub.f32 %v4542_v27, %v4633_v23  ;;  %v508_v27 = vsub.f32 %v4561_v38, %v4633_v23  ;;  %v510_v38 = vsub.f32 %v4587_v54, %v4633_v23  ;;  %v435_v54 = vld [vmem:[%s5920_s3 + $0x18] sm:$0xff] }
  0x3e   : > { %4126 = vrsqrt.f32 %v397_v24 }
  0x3f   : > { %v499_v31 = vmul.f32 0.015625, %v497_v29 }
  0x41   : > { %v501_v34 = vsub.f32 %v499_v31, %v500_v30 }
  0x43   : > { %v502_v35 = vmax.f32 %v501_v34, 0.0  ;;  %v509_v34 = vsub.f32 %v4577_v46, %v4633_v23  ;;  %v511_v46 = vsub.f32 %v4600_v0, %v4633_v23  ;;  %v540_v0 = vld [vmem:[%s5921_s4 + $0x10] sm:$0xff] }
  0x45   : > { %v503_v37 = vadd.f32 1e-05, %v502_v35 }
  0x47   : > { %4128 = vrsqrt.f32 %v503_v37 }
  0x4b   : > { %v4127_v43 = vpop.eup %4126 }
  0x4c   : > { %v407_v45 = vmul.f32 %v4127_v43, %v4642_v40 }
  0x4e   : > { %v411_v52 = vrot.slane %v407_v45, %v410_v41  ;;  %v691_v41 = vld [vmem:[%s5923_s6] sm:$0xff] }
  0x50   : > { %v416_v55 = vmul.f32 %v411_v52, %v403_v44  ;;  %v417_v15 = vmul.f32 %v411_v52, %v404_v47  ;;  %v418_v56 = vmul.f32 %v411_v52, %v405_v48  ;;  %v419_v57 = vmul.f32 %v411_v52, %v406_v49  ;;  %v538_v44 = vld [vmem:[%s5921_s4] sm:$0xff] }
  0x51   : > { %v412_v28 = vmul.f32 %v411_v52, %v399_v50  ;;  %v413_v58 = vmul.f32 %v411_v52, %v400_v51  ;;  %v414_v17 = vmul.f32 %v411_v52, %v401_v53  ;;  %v415_v29 = vmul.f32 %v411_v52, %v402_v1  ;;  %v830_v50 = vld [vmem:[%s5924_s7 + $0x10] sm:$0xff] }
  0x52   : > { %v428_v59 = vadd.f32 %v423_v13, %v416_v55  ;;  %v429_v7 = vadd.f32 %v423_v13, %v417_v15  ;;  %v430_v60 = vadd.f32 %v423_v13, %v418_v56  ;;  %v431_v2 = vadd.f32 %v423_v13, %v419_v57 }
  0x53   : > { %v424_v3 = vadd.f32 %v423_v13, %v412_v28  ;;  %v425_v9 = vadd.f32 %v423_v13, %v413_v58  ;;  %v426_v35 = vadd.f32 %v423_v13, %v414_v17  ;;  %v427_v42 = vadd.f32 %v423_v13, %v415_v29  ;;  %v541_v58 = vld [vmem:[%s5921_s4 + $0x18] sm:$0xff] }
  0x54   : > { %v444_v10 = vadd.f32 %v436_v19, %v428_v59  ;;  %v445_v11 = vadd.f32 %v437_v5, %v429_v7  ;;  %v446_v14 = vadd.f32 %v438_v6, %v430_v60  ;;  %v4129_v24 = vpop.eup %4128  ;;  %v447_v30 = vadd.f32 %v439_v16, %v431_v2  ;;  %v542_v7 = vld [vmem:[%s5921_s4 + $0x20] sm:$0xff]  ;;  %v543_v2 = vld [vmem:[%s5921_s4 + $0x28] sm:$0xff]  ;;  %v545_v16 = vld [vmem:[%s5921_s4 + $0x38] sm:$0xff] }
  0x55   : > { %v440_v21 = vadd.f32 %v432_v61, %v424_v3  ;;  %v441_v22 = vadd.f32 %v433_v62, %v425_v9  ;;  %v513_v31 = vmul.f32 %v4129_v24, %v4642_v40  ;;  %v512_v55 = vsub.f32 %v4608_v12, %v4633_v23  ;;  %v829_v12 = vld [vmem:[%s5924_s7 + $0x8] sm:$0xff]  ;;  %v828_v62 = vld [vmem:[%s5924_s7] sm:$0xff]  ;;  %v544_v9 = vld [vmem:[%s5921_s4 + $0x30] sm:$0xff] }
  0x56   : > { %3799 = vmatprep.mubr.msk.f32.mxu1 %vm341_vm0, %v444_v10  ;;  %v443_v19 = vadd.f32 %v435_v54, %v427_v42 }
  0x57   : > { %3800 = vmatmul.mubr.msk.f32.vlgmr.msra.gmra.mxu1 %vm341_vm0, %v445_v11  ;;  %3793 = vmatprep.mubr.msk.f32.mxu0 %vm341_vm0, %v440_v21  ;;  %v517_v37 = vrot.slane %v513_v31, %v516_v18  ;;  %v560_v18 = vsub.s32 4, %v4637_v36 }
  0x58   : > { %3806 = vmatpush3.msra.mxu1 %v4487_v4  ;;  %3802 = vmatprep.mubr.msk.f32.mxu1 %vm341_vm0, %v446_v14  ;;  %v434_v4 = vld [vmem:[%s5920_s3 + $0x10] sm:$0xff] }
  0x59   : > { %3807 = vmatprep.subr.mxu1 %v693_v8  ;;  %3794 = vmatmul.mubr.msk.f32.vlgmr.msra.gmra.mxu0 %vm341_vm0, %v441_v22  ;;  %v518_v43 = vmul.f32 %v517_v37, %v505_v63  ;;  %v519_v45 = vmul.f32 %v517_v37, %v506_v25  ;;  %v520_v47 = vmul.f32 %v517_v37, %v507_v32  ;;  %v697_v32 = vsub.s32 5, %v4637_v36 }
  0x5a   : > { %3808 = vmatpush3.msra.mxu1 %v693_v8  ;;  %3826 = vmatpush3.msra.mxu0 %v4566_v39  ;;  %v539_v39 = vld [vmem:[%s5921_s4 + $0x8] sm:$0xff]  ;;  %v521_v48 = vmul.f32 %v517_v37, %v508_v27  ;;  %v522_v49 = vmul.f32 %v517_v37, %v509_v34  ;;  %v442_v51 = vadd.f32 %v434_v4, %v426_v35 }
  0x5b   : > { %3803 = vmatmul.mubr.msk.f32.gmra.mxu1 %vm341_vm0, %v447_v30  ;;  %3809 = vmatprep.subr.mxu1 %v692_v26  ;;  %v530_v52 = vadd.f32 %v529_v33, %v518_v43  ;;  %v531_v13 = vadd.f32 %v529_v33, %v519_v45  ;;  %v532_v53 = vadd.f32 %v529_v33, %v520_v47 }
  0x5c   : > { %3810 = vmatpush3.msra.mxu1 %v692_v26  ;;  %v533_v15 = vadd.f32 %v529_v33, %v521_v48  ;;  %v523_v56 = vmul.f32 %v517_v37, %v510_v38  ;;  %v524_v57 = vmul.f32 %v517_v37, %v511_v46  ;;  %v534_v59 = vadd.f32 %v529_v33, %v522_v49 }
  0x5d   : > { %3811 = vmatprep.subr.mxu1 %v691_v41  ;;  %v546_v5 = vadd.f32 %v538_v44, %v530_v52  ;;  %v547_v6 = vadd.f32 %v539_v39, %v531_v13  ;;  %v548_v28 = vadd.f32 %v540_v0, %v532_v53  ;;  %3827 = vmatprep.subr.mxu0 %v830_v50 }
  0x5e   : > { %3812 = vmatpush3.msra.mxu1 %v691_v41  ;;  %3796 = vmatprep.mubr.msk.f32.mxu0 %vm341_vm0, %v442_v51  ;;  %v549_v23 = vadd.f32 %v541_v58, %v533_v15  ;;  %v535_v60 = vadd.f32 %v529_v33, %v523_v56  ;;  %v525_v61 = vmul.f32 %v517_v37, %v512_v55 }
  0x5f   : > { %3813 = vmatprep.mubr.msk.f32.mxu1 %vm341_vm0, %v546_v5  ;;  %3828 = vmatpush3.msra.mxu0 %v830_v50  ;;  %v550_v1 = vadd.f32 %v542_v7, %v534_v59  ;;  %v536_v3 = vadd.f32 %v529_v33, %v524_v57  ;;  %v4780_v24 = vrot.slane %v4642_v40, %v560_v18 }
  0x60   : > { %3814 = vmatmul.mubr.msk.f32.vlgmr.msra.gmra.mxu1 %vm341_vm0, %v547_v6  ;;  %3797 = vmatmul.mubr.msk.f32.gmra.mxu0 %vm341_vm0, %v443_v19  ;;  %v551_v10 = vadd.f32 %v543_v2, %v535_v60  ;;  %v537_v11 = vadd.f32 %v529_v33, %v525_v61  ;;  %v698_v34 = vrot.slane %v4642_v40, %v697_v32 }
  0x61   : > { %3816 = vmatprep.mubr.msk.f32.mxu1 %vm341_vm0, %v548_v28  ;;  %3829 = vmatprep.subr.mxu0 %v829_v12  ;;  %v552_v14 = vadd.f32 %v544_v9, %v536_v3 }
  0x62   : > { %3830 = vmatpush3.msra.mxu0 %v829_v12  ;;  %3833 = vmatprep.mubr.msk.f32.mxu0 %vm341_vm0, %v546_v5  ;;  %v553_v17 = vadd.f32 %v545_v16, %v537_v11 }
  0x63   : > { %3831 = vmatprep.subr.mxu0 %v828_v62 }
  0x64   : > { %3817 = vmatmul.mubr.msk.f32.gmra.mxu1 %vm341_vm0, %v549_v23  ;;  %3832 = vmatpush3.msra.mxu0 %v828_v62 }
  0x65   : > { %3819 = vmatprep.mubr.msk.f32.mxu1 %vm341_vm0, %v550_v1  ;;  %3834 = vmatmul.mubr.msk.f32.vlgmr.msra.gmra.mxu0 %vm341_vm0, %v547_v6 }
  0x66   : > { %3836 = vmatprep.mubr.msk.f32.mxu0 %vm341_vm0, %v548_v28 }
  0x68   : > { %3820 = vmatmul.mubr.msk.f32.gmra.mxu1 %vm341_vm0, %v551_v10 }
  0x69   : > { %3822 = vmatprep.mubr.msk.f32.mxu1 %vm341_vm0, %v552_v14  ;;  %3837 = vmatmul.mubr.msk.f32.gmra.mxu0 %vm341_vm0, %v549_v23 }
  0x6a   : > { %3839 = vmatprep.mubr.msk.f32.mxu0 %vm341_vm0, %v550_v1 }
  0x6c   : > { %3823 = vmatmul.mubr.msk.f32.gmra.mxu1 %vm341_vm0, %v553_v17 }
  0x6d   : > { %3840 = vmatmul.mubr.msk.f32.gmra.mxu0 %vm341_vm0, %v551_v10 }
  0x6e   : > { %3842 = vmatprep.mubr.msk.f32.mxu0 %vm341_vm0, %v552_v14 }
  0x71   : > { %3843 = vmatmul.mubr.msk.f32.gmra.mxu0 %vm341_vm0, %v553_v17 }
 0x117   : > { %v3801_v20 = vpop.f32.mrf.mxu1 }
 0x118   : > { %v4873_v53 = vadd.f32 %v3801_v20, %v4780_v24 }
 0x119   : > { %v4777_v21 = vpop.f32.mrf.mxu1  ;;  %v3795_v22 = vpop.f32.mrf.mxu0 }
 0x11a   : > { %v4834_v0 = vadd.f32 %v3795_v22, %v4780_v24  ;;  %v4883_v55 = vadd.f32 %v4777_v21, %v4780_v24 }
 0x11b   : > { %v4782_v8 = vpop.f32.mrf.mxu1  ;;  %v652_v63 = vpop.f32.mrf.mxu0 }
 0x11c   : > { %v4785_v25 = vadd.f32 %v652_v63, %v4780_v24  ;;  %v4891_v56 = vadd.f32 %v4782_v8, %v4780_v24 }
 0x11d   : > { %v4787_v29 = vpop.f32.mrf.mxu1 }
 0x11e   : > { %3861 = vmatprep.mubr.msk.f32.mxu1 %vm937_vm1, %v4785_v25  ;;  %v4901_v57 = vadd.f32 %v4787_v29, %v4780_v24 }
 0x120   : > { %v3815_v30 = vpop.f32.mrf.mxu1  ;;  %v3798_v33 = vpop.f32.mrf.mxu0 }
 0x121   : > { %v4840_v48 = vadd.f32 %v3815_v30, %v698_v34  ;;  %v4849_v50 = vadd.f32 %v3798_v33, %v4780_v24 }
 0x122   : > { %v789_v31 = vpop.f32.mrf.mxu1  ;;  %v662_v46 = vpop.f32.mrf.mxu0 }
 0x123   : > { %v4829_v39 = vadd.f32 %v789_v31, %v698_v34  ;;  %v4860_v52 = vadd.f32 %v662_v46, %v4780_v24 }
 0x124   : > { %v3818_v26 = vpop.f32.mrf.mxu1 }
 0x125   : > { %v4813_v40 = vpop.f32.mrf.mxu0  ;;  %v4823_v47 = vadd.f32 %v3818_v26, %v698_v34 }
 0x126   : > { %v799_v27 = vpop.f32.mrf.mxu1 }
 0x127   : > { %v4815_v45 = vadd.f32 %v799_v27, %v698_v34  ;;  %v4827_v54 = vpop.f32.mrf.mxu0 }
 0x128   : > { %v3821_v35 = vpop.f32.mrf.mxu1 }
 0x129   : > { %v4793_v37 = vadd.f32 %v3821_v35, %v698_v34  ;;  %v4844_v49 = vpop.f32.mrf.mxu0 }
 0x12a   : > { %v809_v4 = vpop.f32.mrf.mxu1 }
 0x12b   : > { %1206 = vrot.lane.b32.xlu1 %v4793_v37, %s4361_s22  ;;  %v4799_v42 = vadd.f32 %v809_v4, %v698_v34  ;;  %v4857_v51 = vpop.f32.mrf.mxu0 }
 0x12c   : > { %v3824_v41 = vpop.f32.mrf.mxu1 }
 0x12d   : > { %v4797_v38 = vadd.f32 %v3824_v41, %v698_v34  ;;  %v4870_v13 = vpop.f32.mrf.mxu0 }
 0x12e   : > { %v819_v43 = vpop.f32.mrf.mxu1 }
 0x12f   : > { %v4801_v44 = vadd.f32 %v819_v43, %v698_v34  ;;  %1210 = vrot.lane.b32.xlu0 %v4797_v38, %s4361_s22  ;;  %3845 = vmatprep.subr.msk.mxu1 %vm937_vm1, %v4797_v38  ;;  %v4887_v15 = vpop.f32.mrf.mxu0 }
 0x130   : > { %1204 = vrot.lane.b32.xlu1 %v4799_v42, %s4361_s22  ;;  %3846 = vmatpush3.xpose.msk.msra.mxu1 %vm937_vm1, %v4797_v38 }
 0x131   : > { %3847 = vmatprep.subr.msk.mxu1 %vm937_vm1, %v4801_v44  ;;  %v4905_v19 = vpop.f32.mrf.mxu0 }
 0x133   : > { %1208 = vrot.lane.b32.xlu0 %v4801_v44, %s4361_s22  ;;  %v4913_v5 = vpop.f32.mrf.mxu0 }
 0x134   : > { %1200 = vrot.lane.b32.xlu1 %v4815_v45, %s4361_s22  ;;  %3848 = vmatpush3.xpose.msk.msra.mxu1 %vm937_vm1, %v4801_v44 }
 0x135   : > { %3849 = vmatprep.subr.msk.mxu1 %vm937_vm1, %v4793_v37 }
 0x137   : > { %1202 = vrot.lane.b32.xlu0 %v4823_v47, %s4361_s22 }
 0x138   : > { %1196 = vrot.lane.b32.xlu1 %v4829_v39, %s4361_s22  ;;  %3850 = vmatpush3.xpose.msk.msra.mxu1 %vm937_vm1, %v4793_v37 }
 0x139   : > { %3851 = vmatprep.subr.msk.mxu1 %vm937_vm1, %v4799_v42 }
 0x13b   : > { %1198 = vrot.lane.b32.xlu0 %v4840_v48, %s4361_s22 }
 0x13c   : > { %1182 = vrot.lane.b32.xlu1 %v4834_v0, %s4361_s22  ;;  %3852 = vmatpush3.xpose.msk.msra.mxu1 %vm937_vm1, %v4799_v42 }
 0x13d   : > { %3853 = vmatprep.subr.msk.mxu1 %vm937_vm1, %v4823_v47 }
 0x13f   : > { %1180 = vrot.lane.b32.xlu0 %v4785_v25, %s4361_s22 }
 0x140   : > { %1186 = vrot.lane.b32.xlu1 %v4849_v50, %s4361_s22  ;;  %3854 = vmatpush3.xpose.msk.msra.mxu1 %vm937_vm1, %v4823_v47 }
 0x141   : > { %3855 = vmatprep.subr.msk.mxu1 %vm937_vm1, %v4815_v45 }
 0x143   : > { %1184 = vrot.lane.b32.xlu0 %v4860_v52, %s4361_s22 }
 0x144   : > { %1190 = vrot.lane.b32.xlu1 %v4873_v53, %s4361_s22  ;;  %3856 = vmatpush3.xpose.msk.msra.mxu1 %vm937_vm1, %v4815_v45 }
 0x145   : > { %3857 = vmatprep.subr.msk.mxu1 %vm937_vm1, %v4840_v48 }
 0x147   : > { %1188 = vrot.lane.b32.xlu0 %v4883_v55, %s4361_s22 }
 0x148   : > { %1194 = vrot.lane.b32.xlu1 %v4891_v56, %s4361_s22  ;;  %3858 = vmatpush3.xpose.msk.msra.mxu1 %vm937_vm1, %v4840_v48 }
 0x149   : > { %3859 = vmatprep.subr.msk.mxu1 %vm937_vm1, %v4829_v39 }
 0x14b   : > { %1192 = vrot.lane.b32.xlu0 %v4901_v57, %s4361_s22 }
 0x14c   : > { %1459 = vrot.lane.b32.xlu1 %v4905_v19, %s4362_s23  ;;  %3860 = vmatpush3.xpose.msk.msra.mxu1 %vm937_vm1, %v4829_v39 }
 0x14f   : > { %1457 = vrot.lane.b32.xlu0 %v4913_v5, %s4362_s23  ;;  %3862 = vmatmul.mubr.msk.f32.vlgmr.msra.gmra.mxu1 %vm937_vm1, %v4834_v0 }
 0x150   : > { %1455 = vrot.lane.b32.xlu1 %v4870_v13, %s4362_s23  ;;  %3864 = vmatprep.mubr.msk.f32.mxu1 %vm937_vm1, %v4860_v52 }
 0x153   : > { %1451 = vrot.lane.b32.xlu0 %v4844_v49, %s4362_s23  ;;  %3865 = vmatmul.mubr.msk.f32.gmra.mxu1 %vm937_vm1, %v4849_v50 }
 0x154   : > { %1453 = vrot.lane.b32.xlu1 %v4887_v15, %s4362_s23  ;;  %3867 = vmatprep.mubr.msk.f32.mxu1 %vm937_vm1, %v4883_v55 }
 0x157   : > { %1447 = vrot.lane.b32.xlu0 %v4813_v40, %s4362_s23  ;;  %3868 = vmatmul.mubr.msk.f32.gmra.mxu1 %vm937_vm1, %v4873_v53 }
 0x158   : > { %1449 = vrot.lane.b32.xlu1 %v4857_v51, %s4362_s23  ;;  %3870 = vmatprep.mubr.msk.f32.mxu1 %vm937_vm1, %v4901_v57 }
 0x15b   : > { %1757 = vrot.lane.b32.xlu0 %v4797_v38, %s4363_s24  ;;  %3871 = vmatmul.mubr.msk.f32.gmra.mxu1 %vm937_vm1, %v4891_v56 }
 0x15c   : > { %1445 = vrot.lane.b32.xlu1 %v4827_v54, %s4362_s23 }
 0x160   : > { %1755 = vrot.lane.b32.xlu1 %v4801_v44, %s4363_s24 }
 0x19d   : > { %v1207_v6 = vpop.permute.xlu1 %1206 }
 0x1a1   : > { %v1211_v28 = vpop.permute.xlu0 %1210 }
 0x1a2   : > { %v1205_v58 = vpop.permute.xlu1 %1204  ;;  %3873 = vmatprep.subr.msk.mxu0 %vm937_vm1, %v1211_v28 }
 0x1a3   : > { %3874 = vmatpush3.xpose.msk.msra.mxu0 %vm937_vm1, %v1211_v28 }
 0x1a5   : > { %v1209_v59 = vpop.permute.xlu0 %1208 }
 0x1a6   : > { %v1201_v7 = vpop.permute.xlu1 %1200  ;;  %3875 = vmatprep.subr.msk.mxu0 %vm937_vm1, %v1209_v59 }
 0x1a7   : > { %3876 = vmatpush3.xpose.msk.msra.mxu0 %vm937_vm1, %v1209_v59 }
 0x1a8   : > { %3877 = vmatprep.subr.msk.mxu0 %vm937_vm1, %v1207_v6 }
 0x1a9   : > { %v1203_v12 = vpop.permute.xlu0 %1202 }
 0x1aa   : > { %v1197_v23 = vpop.permute.xlu1 %1196 }
 0x1ab   : > { %3878 = vmatpush3.xpose.msk.msra.mxu0 %vm937_vm1, %v1207_v6 }
 0x1ac   : > { %3879 = vmatprep.subr.msk.mxu0 %vm937_vm1, %v1205_v58 }
 0x1ad   : > { %v1199_v60 = vpop.permute.xlu0 %1198 }
 0x1ae   : > { %v1183_v61 = vpop.permute.xlu1 %1182 }
 0x1af   : > { %3880 = vmatpush3.xpose.msk.msra.mxu0 %vm937_vm1, %v1205_v58 }
 0x1b0   : > { %3881 = vmatprep.subr.msk.mxu0 %vm937_vm1, %v1203_v12 }
 0x1b1   : > { %v1181_v62 = vpop.permute.xlu0 %1180 }
 0x1b2   : > { %v1187_v1 = vpop.permute.xlu1 %1186  ;;  %3889 = vmatprep.mubr.msk.f32.mxu0 %vm937_vm1, %v1181_v62 }
 0x1b3   : > { %3882 = vmatpush3.xpose.msk.msra.mxu0 %vm937_vm1, %v1203_v12 }
 0x1b4   : > { %3883 = vmatprep.subr.msk.mxu0 %vm937_vm1, %v1201_v7 }
 0x1b5   : > { %v1185_v2 = vpop.permute.xlu0 %1184 }
 0x1b6   : > { %v1191_v3 = vpop.permute.xlu1 %1190 }
 0x1b7   : > { %3884 = vmatpush3.xpose.msk.msra.mxu0 %vm937_vm1, %v1201_v7 }
 0x1b8   : > { %3885 = vmatprep.subr.msk.mxu0 %vm937_vm1, %v1199_v60 }
 0x1b9   : > { %v1189_v9 = vpop.permute.xlu0 %1188 }
 0x1ba   : > { %v1195_v10 = vpop.permute.xlu1 %1194 }
 0x1bb   : > { %3886 = vmatpush3.xpose.msk.msra.mxu0 %vm937_vm1, %v1199_v60 }
 0x1bc   : > { %3887 = vmatprep.subr.msk.mxu0 %vm937_vm1, %v1197_v23 }
 0x1bd   : > { %v1193_v11 = vpop.permute.xlu0 %1192 }
 0x1be   : > { %v1460_v14 = vpop.permute.xlu1 %1459 }
 0x1bf   : > { %3888 = vmatpush3.xpose.msk.msra.mxu0 %vm937_vm1, %v1197_v23  ;;  %3901 = vmatprep.subr.mxu1 %v1460_v14 }
 0x1c0   : > { %3902 = vmatpush3.msra.mxu1 %v1460_v14  ;;  %3929 = vmatprep.subr.mxu0 %v4905_v19 }
 0x1c1   : > { %v1458_v16 = vpop.permute.xlu0 %1457 }
 0x1c2   : > { %v1456_v17 = vpop.permute.xlu1 %1455  ;;  %3890 = vmatmul.mubr.msk.f32.vlgmr.msra.gmra.mxu0 %vm937_vm1, %v1183_v61  ;;  %3903 = vmatprep.subr.mxu1 %v1458_v16 }
 0x1c3   : > { %3904 = vmatpush3.msra.mxu1 %v1458_v16  ;;  %3892 = vmatprep.mubr.msk.f32.mxu0 %vm937_vm1, %v1185_v2 }
 0x1c4   : > { %3905 = vmatprep.subr.mxu1 %v1456_v17  ;;  %3930 = vmatpush3.msra.mxu0 %v4905_v19 }
 0x1c5   : > { %v1452_v18 = vpop.permute.xlu0 %1451  ;;  %3906 = vmatpush3.msra.mxu1 %v1456_v17  ;;  %3931 = vmatprep.subr.mxu0 %v4913_v5 }
 0x1c6   : > { %v1454_v20 = vpop.permute.xlu1 %1453  ;;  %3893 = vmatmul.mubr.msk.f32.gmra.mxu0 %vm937_vm1, %v1187_v1 }
 0x1c7   : > { %3907 = vmatprep.subr.mxu1 %v1454_v20  ;;  %3895 = vmatprep.mubr.msk.f32.mxu0 %vm937_vm1, %v1189_v9 }
 0x1c8   : > { %3908 = vmatpush3.msra.mxu1 %v1454_v20  ;;  %3932 = vmatpush3.msra.mxu0 %v4913_v5 }
 0x1c9   : > { %3909 = vmatprep.subr.mxu1 %v1452_v18  ;;  %3933 = vmatprep.subr.mxu0 %v4870_v13  ;;  %v1448_v22 = vpop.permute.xlu0 %1447 }
 0x1ca   : > { %v1450_v21 = vpop.permute.xlu1 %1449  ;;  %3910 = vmatpush3.msra.mxu1 %v1452_v18  ;;  %3896 = vmatmul.mubr.msk.f32.gmra.mxu0 %vm937_vm1, %v1191_v3 }
 0x1cb   : > { %3911 = vmatprep.subr.mxu1 %v1450_v21  ;;  %3898 = vmatprep.mubr.msk.f32.mxu0 %vm937_vm1, %v1193_v11 }
 0x1cc   : > { %3912 = vmatpush3.msra.mxu1 %v1450_v21  ;;  %3934 = vmatpush3.msra.mxu0 %v4870_v13 }
 0x1cd   : > { %3913 = vmatprep.subr.mxu1 %v1448_v22  ;;  %3935 = vmatprep.subr.mxu0 %v4887_v15  ;;  %v4979_v8 = vpop.permute.xlu0 %1757 }
 0x1ce   : > { %v1446_v24 = vpop.permute.xlu1 %1445  ;;  %3914 = vmatpush3.msra.mxu1 %v1448_v22  ;;  %3899 = vmatmul.mubr.msk.f32.gmra.mxu0 %vm937_vm1, %v1195_v10 }
 0x1cf   : > { %3915 = vmatprep.subr.mxu1 %v1446_v24  ;;  %3936 = vmatpush3.msra.mxu0 %v4887_v15 }
 0x1d0   : > { %3916 = vmatpush3.msra.mxu1 %v1446_v24  ;;  %3937 = vmatprep.subr.mxu0 %v4844_v49 }
 0x1d1   : > { %3957 = vmatprep.subr.msk.mxu1 %vm937_vm1, %v4979_v8  ;;  %3938 = vmatpush3.msra.mxu0 %v4844_v49 }
 0x1d2   : > { %3939 = vmatprep.subr.mxu0 %v4857_v51  ;;  %v5003_v58 = vpop.permute.xlu1 %1755 }
 0x1d3   : > { %3940 = vmatpush3.msra.mxu0 %v4857_v51 }
 0x1d4   : > { %3941 = vmatprep.subr.mxu0 %v4813_v40 }
 0x1d5   : > { %3942 = vmatpush3.msra.mxu0 %v4813_v40 }
 0x1d6   : > { %3943 = vmatprep.subr.mxu0 %v4827_v54 }
 0x1d7   : > { %3944 = vmatpush3.msra.mxu0 %v4827_v54 }
 0x282   : > { %v3891_v63 = vpop.f32.mrf.mxu0 }
 0x283   : > { %v1352_v29 = vsel %vm1091_vm2, %v3891_v63, -inf }
 0x284   : > { %1353 = vmax.xlane.f32.xlu1 %v1352_v29  ;;  %v1310_v30 = vpop.f32.mrf.mxu0 }
 0x285   : > { %v1349_v31 = vsel %vm1091_vm2, %v1310_v30, -inf }
 0x286   : > { %1350 = vmax.xlane.f32.xlu0 %v1349_v31  ;;  %v3894_v32 = vpop.f32.mrf.mxu0 }
 0x287   : > { %v1358_v26 = vsel %vm1091_vm2, %v3894_v32, -inf }
 0x288   : > { %v1320_v27 = vpop.f32.mrf.mxu0 }
 0x289   : > { %v1355_v35 = vsel %vm1091_vm2, %v1320_v27, -inf }
 0x28a   : > { %1359 = vmax.xlane.f32.xlu0 %v1358_v26  ;;  %v3897_v34 = vpop.f32.mrf.mxu0 }
 0x28b   : > { %v1364_v43 = vsel %vm1091_vm2, %v3897_v34, -inf }
 0x28c   : > { %v1330_v33 = vpop.f32.mrf.mxu0 }
 0x28d   : > { %v1361_v4 = vsel %vm1091_vm2, %v1330_v33, -inf }
 0x28e   : > { %1356 = vmax.xlane.f32.xlu0 %v1355_v35  ;;  %1362 = vmax.xlane.f32.xlu1 %v1361_v4  ;;  %v3900_v41 = vpop.f32.mrf.mxu0 }
 0x28f   : > { %v1370_v28 = vsel %vm1091_vm2, %v3900_v41, -inf }
 0x290   : > { %v1340_v46 = vpop.f32.mrf.mxu0 }
 0x291   : > { %v1367_v6 = vsel %vm1091_vm2, %v1340_v46, -inf }
 0x292   : > { %1365 = vmax.xlane.f32.xlu0 %v1364_v43  ;;  %1368 = vmax.xlane.f32.xlu1 %v1367_v6 }
 0x296   : > { %1371 = vmax.xlane.f32.xlu0 %v1370_v28 }
 0x2a3   : > { %1751 = vrot.lane.b32.xlu1 %v4799_v42, %s4363_s24 }
 0x2ac   : > { %1753 = vrot.lane.b32.xlu0 %v4793_v37, %s4363_s24 }
 0x30d   : > { %v1354_v59 = vpop.xlane.xlu1 %1353 }
 0x30e   : > { %v1374_v7 = vsub.f32 %v3891_v63, %v1354_v59 }
 0x30f   : > { %v1351_v12 = vpop.xlane.xlu0 %1350 }
 0x310   : > { %v1383_v23 = vmul.f32 1.442695, %v1374_v7  ;;  %v1373_v60 = vsub.f32 %v1310_v30, %v1351_v12 }
 0x312   : > { %4130 = vpow2.f32 %v1383_v23  ;;  %v1381_v61 = vmul.f32 1.442695, %v1373_v60  ;;  %v5061_v23 = vpop.f32.mrf.mxu1 }
 0x313   : > { %v1360_v9 = vpop.xlane.xlu0 %1359 }
 0x314   : > { %4132 = vpow2.f32 %v1381_v61  ;;  %v1376_v17 = vsub.f32 %v3894_v32, %v1360_v9  ;;  %v5063_v60 = vpop.f32.mrf.mxu1 }
 0x316   : > { %v1387_v22 = vmul.f32 1.442695, %v1376_v17  ;;  %v5065_v61 = vpop.f32.mrf.mxu1 }
 0x317   : > { %v1357_v10 = vpop.xlane.xlu0 %1356  ;;  %v1363_v11 = vpop.xlane.xlu1 %1362 }
 0x318   : > { %v1375_v14 = vsub.f32 %v1320_v27, %v1357_v10  ;;  %v1377_v18 = vsub.f32 %v1330_v33, %v1363_v11  ;;  %v1092_v10 = vsel %vm1091_vm2, %v5063_v60, -inf  ;;  %v1095_v11 = vsel %vm1091_vm2, %v5061_v23, -inf }
 0x31a   : > { %v1385_v20 = vmul.f32 1.442695, %v1375_v14  ;;  %v1389_v29 = vmul.f32 1.442695, %v1377_v18 }
 0x31b   : > { %v1366_v16 = vpop.xlane.xlu0 %1365  ;;  %v1369_v21 = vpop.xlane.xlu1 %1368 }
 0x31c   : > { %v1378_v24 = vsub.f32 %v3897_v34, %v1366_v16  ;;  %4134 = vpow2.f32 %v1385_v20  ;;  %v1379_v30 = vsub.f32 %v1340_v46, %v1369_v21 }
 0x31d   : > { %4136 = vpow2.f32 %v1387_v22 }
 0x31e   : > { %v1391_v31 = vmul.f32 1.442695, %v1378_v24  ;;  %4138 = vpow2.f32 %v1389_v29  ;;  %v1393_v35 = vmul.f32 1.442695, %v1379_v30  ;;  %v1101_v24 = vsel %vm1091_vm2, %v5065_v61, -inf }
 0x31f   : > { %v5005_v62 = vpop.eup %4130  ;;  %v1372_v63 = vpop.xlane.xlu0 %1371 }
 0x320   : > { %v1400_v1 = vsel %vm1091_vm2, %v5005_v62, 0.0  ;;  %v1380_v26 = vsub.f32 %v3900_v41, %v1372_v63  ;;  %4140 = vpow2.f32 %v1391_v31  ;;  %v1752_v18 = vpop.permute.xlu1 %1751 }
 0x321   : > { %v5009_v2 = vpop.eup %4132  ;;  %1401 = vadd.xlane.f32.xlu0 %v1400_v1  ;;  %4142 = vpow2.f32 %v1393_v35  ;;  %v5067_v1 = vpop.f32.mrf.mxu1 }
 0x322   : > { %v1397_v3 = vsel %vm1091_vm2, %v5009_v2, 0.0  ;;  %v1395_v4 = vmul.f32 1.442695, %v1380_v26  ;;  %v1098_v17 = vsel %vm1091_vm2, %v5067_v1, -inf }
 0x323   : > { %1398 = vadd.xlane.f32.xlu1 %v1397_v3  ;;  %v5069_v3 = vpop.f32.mrf.mxu1  ;;  %v1754_v16 = vpop.permute.xlu0 %1753 }
 0x324   : > { %4144 = vpow2.f32 %v1395_v4  ;;  %v1107_v30 = vsel %vm1091_vm2, %v5069_v3, -inf }
 0x325   : > { %v5071_v9 = vpop.f32.mrf.mxu1 }
 0x326   : > { %v1104_v20 = vsel %vm1091_vm2, %v5071_v9, -inf }
 0x327   : > { %v5077_v14 = vpop.f32.mrf.mxu1 }
 0x328   : > { %v1113_v31 = vsel %vm1091_vm2, %v5077_v14, -inf }
 0x329   : > { %v5017_v27 = vpop.eup %4134  ;;  %v5083_v21 = vpop.f32.mrf.mxu1 }
 0x32a   : > { %v5019_v32 = vpop.eup %4136  ;;  %v1403_v34 = vsel %vm1091_vm2, %v5017_v27, 0.0  ;;  %v1110_v29 = vsel %vm1091_vm2, %v5083_v21, -inf }
 0x32b   : > { %v5023_v33 = vpop.eup %4138  ;;  %v1406_v46 = vsel %vm1091_vm2, %v5019_v32, 0.0 }
 0x32c   : > { %v1409_v43 = vsel %vm1091_vm2, %v5023_v33, 0.0 }
 0x32d   : > { %v5027_v41 = vpop.eup %4140 }
 0x32e   : > { %v5031_v6 = vpop.eup %4142  ;;  %v1412_v28 = vsel %vm1091_vm2, %v5027_v41, 0.0 }
 0x32f   : > { %v1415_v7 = vsel %vm1091_vm2, %v5031_v6, 0.0 }
 0x331   : > { %v5035_v59 = vpop.eup %4144 }
 0x332   : > { %v1418_v12 = vsel %vm1091_vm2, %v5035_v59, 0.0 }
 0x334   : > { %1747 = vrot.lane.b32.xlu1 %v4815_v45, %s4363_s24 }
 0x337   : > { %1749 = vrot.lane.b32.xlu0 %v4823_v47, %s4363_s24 }
 0x356   : > { %1404 = vadd.xlane.f32.xlu0 %v1403_v34 }
 0x358   : > { %1407 = vadd.xlane.f32.xlu1 %v1406_v46 }
 0x35a   : > { %1410 = vadd.xlane.f32.xlu0 %v1409_v43 }
 0x35c   : > { %1413 = vadd.xlane.f32.xlu1 %v1412_v28 }
 0x35e   : > { %1416 = vadd.xlane.f32.xlu0 %v1415_v7 }
 0x360   : > { %1419 = vadd.xlane.f32.xlu1 %v1418_v12 }
 0x371   : > { %1743 = vrot.lane.b32.xlu1 %v4829_v39, %s4363_s24 }
 0x374   : > { %1745 = vrot.lane.b32.xlu0 %v4840_v48, %s4363_s24 }
 0x375   : > { %1729 = vrot.lane.b32.xlu1 %v4834_v0, %s4363_s24 }
 0x378   : > { %1727 = vrot.lane.b32.xlu0 %v4785_v25, %s4363_s24 }
 0x379   : > { %1733 = vrot.lane.b32.xlu1 %v4849_v50, %s4363_s24 }
 0x37c   : > { %1731 = vrot.lane.b32.xlu0 %v4860_v52, %s4363_s24 }
 0x37d   : > { %1737 = vrot.lane.b32.xlu1 %v4873_v53, %s4363_s24 }
 0x380   : > { %1735 = vrot.lane.b32.xlu0 %v4883_v55, %s4363_s24 }
 0x381   : > { %1741 = vrot.lane.b32.xlu1 %v4891_v56, %s4363_s24 }
 0x384   : > { %1739 = vrot.lane.b32.xlu0 %v4901_v57, %s4363_s24  ;;  %s3403_s24 = scalar_lea.hbm %s5925_s8, %s3620_s20 }
 0x3a3   : > { %1093 = vmax.xlane.f32.xlu0 %v1092_v10 }
 0x3a5   : > { %1096 = vmax.xlane.f32.xlu1 %v1095_v11 }
 0x3a7   : > { %1099 = vmax.xlane.f32.xlu0 %v1098_v17 }
 0x3a9   : > { %1105 = vmax.xlane.f32.xlu1 %v1104_v20 }
 0x3aa   : > { %v1402_v22 = vpop.xlane.xlu0 %1401 }
 0x3ab   : > { %1102 = vmax.xlane.f32.xlu0 %v1101_v24  ;;  %4146 = vrcp.f32 %v1402_v22 }
 0x3ac   : > { %v1399_v63 = vpop.xlane.xlu1 %1398 }
 0x3ad   : > { %4148 = vrcp.f32 %v1399_v63  ;;  %1111 = vmax.xlane.f32.xlu1 %v1110_v29 }
 0x3af   : > { %1108 = vmax.xlane.f32.xlu0 %v1107_v30 }
 0x3b3   : > { %1114 = vmax.xlane.f32.xlu0 %v1113_v31 }
 0x3b8   : > { %v4147_v26 = vpop.eup %4146 }
 0x3b9   : > { %v1430_v34 = vmul.f32 %v4147_v26, %v5005_v62  ;;  %v1750_v62 = vpop.permute.xlu0 %1749 }
 0x3ba   : > { %v4149_v35 = vpop.eup %4148 }
 0x3bb   : > { %v1429_v4 = vmul.f32 %v4149_v35, %v5009_v2  ;;  %v1748_v2 = vpop.permute.xlu1 %1747 }
 0x3bd   : > { %3917 = vmatprep.mubr.msk.f32.mxu1 %vm1091_vm2, %v1429_v4 }
 0x3be   : > { %3918 = vmatmul.mubr.msk.f32.vlgmr.msra.gmra.mxu1 %vm1091_vm2, %v1430_v34 }
 0x3bf   : > { %3958 = vmatpush3.xpose.msk.msra.mxu1 %vm937_vm1, %v4979_v8 }
 0x3c0   : > { %3959 = vmatprep.subr.msk.mxu1 %vm937_vm1, %v5003_v58 }
 0x3c3   : > { %3960 = vmatpush3.xpose.msk.msra.mxu1 %vm937_vm1, %v5003_v58 }
 0x3c4   : > { %3961 = vmatprep.subr.msk.mxu1 %vm937_vm1, %v1754_v16 }
 0x3c7   : > { %3962 = vmatpush3.xpose.msk.msra.mxu1 %vm937_vm1, %v1754_v16 }
 0x3c8   : > { %3963 = vmatprep.subr.msk.mxu1 %vm937_vm1, %v1752_v18 }
 0x3cb   : > { %3964 = vmatpush3.xpose.msk.msra.mxu1 %vm937_vm1, %v1752_v18 }
 0x3cc   : > { %3965 = vmatprep.subr.msk.mxu1 %vm937_vm1, %v1750_v62 }
 0x3cf   : > { %3966 = vmatpush3.xpose.msk.msra.mxu1 %vm937_vm1, %v1750_v62 }
 0x3d0   : > { %3967 = vmatprep.subr.msk.mxu1 %vm937_vm1, %v1748_v2 }
 0x3d3   : > { %3968 = vmatpush3.xpose.msk.msra.mxu1 %vm937_vm1, %v1748_v2 }
 0x3df   : > { %v1405_v8 = vpop.xlane.xlu0 %1404 }
 0x3e0   : > { %4150 = vrcp.f32 %v1405_v8 }
 0x3e1   : > { %v1408_v58 = vpop.xlane.xlu1 %1407 }
 0x3e2   : > { %4152 = vrcp.f32 %v1408_v58 }
 0x3e3   : > { %v1411_v46 = vpop.xlane.xlu0 %1410 }
 0x3e4   : > { %4154 = vrcp.f32 %v1411_v46 }
 0x3e5   : > { %v1414_v43 = vpop.xlane.xlu1 %1413 }
 0x3e6   : > { %4156 = vrcp.f32 %v1414_v43 }
 0x3e7   : > { %v1417_v28 = vpop.xlane.xlu0 %1416 }
 0x3e8   : > { %4158 = vrcp.f32 %v1417_v28 }
 0x3e9   : > { %v1420_v7 = vpop.xlane.xlu1 %1419 }
 0x3ea   : > { %4160 = vrcp.f32 %v1420_v7 }
 0x3eb   : > { %v1746_v12 = vpop.permute.xlu0 %1745 }
 0x3ec   : > { %3969 = vmatprep.subr.msk.mxu1 %vm937_vm1, %v1746_v12 }
 0x3ed   : > { %v4151_v10 = vpop.eup %4150  ;;  %v1744_v11 = vpop.permute.xlu1 %1743  ;;  %3970 = vmatpush3.xpose.msk.msra.mxu1 %vm937_vm1, %v1746_v12 }
 0x3ee   : > { %3971 = vmatprep.subr.msk.mxu1 %vm937_vm1, %v1744_v11  ;;  %v1431_v16 = vmul.f32 %v4151_v10, %v5017_v27 }
 0x3ef   : > { %v4153_v17 = vpop.eup %4152  ;;  %v1728_v63 = vpop.permute.xlu0 %1727 }
 0x3f0   : > { %3920 = vmatprep.mubr.msk.f32.mxu1 %vm1091_vm2, %v1431_v16  ;;  %v1432_v18 = vmul.f32 %v4153_v17, %v5019_v32 }
 0x3f1   : > { %v4155_v20 = vpop.eup %4154  ;;  %3972 = vmatpush3.xpose.msk.msra.mxu1 %vm937_vm1, %v1744_v11  ;;  %v1730_v32 = vpop.permute.xlu1 %1729 }
 0x3f2   : > { %3921 = vmatmul.mubr.msk.f32.gmra.mxu1 %vm1091_vm2, %v1432_v18  ;;  %v1433_v22 = vmul.f32 %v4155_v20, %v5023_v33 }
 0x3f3   : > { %v4157_v24 = vpop.eup %4156  ;;  %v1732_v35 = vpop.permute.xlu0 %1731 }
 0x3f4   : > { %3923 = vmatprep.mubr.msk.f32.mxu1 %vm1091_vm2, %v1433_v22  ;;  %v1434_v29 = vmul.f32 %v4157_v24, %v5027_v41 }
 0x3f5   : > { %v4159_v30 = vpop.eup %4158  ;;  %v1734_v33 = vpop.permute.xlu1 %1733 }
 0x3f6   : > { %3924 = vmatmul.mubr.msk.f32.gmra.mxu1 %vm1091_vm2, %v1434_v29  ;;  %v1435_v27 = vmul.f32 %v4159_v30, %v5031_v6 }
 0x3f7   : > { %v4161_v31 = vpop.eup %4160  ;;  %v1736_v41 = vpop.permute.xlu0 %1735 }
 0x3f8   : > { %3926 = vmatprep.mubr.msk.f32.mxu1 %vm1091_vm2, %v1435_v27  ;;  %v1436_v26 = vmul.f32 %v4161_v31, %v5035_v59 }
 0x3f9   : > { %v1738_v6 = vpop.permute.xlu1 %1737 }
 0x3fa   : > { %3927 = vmatmul.mubr.msk.f32.gmra.mxu1 %vm1091_vm2, %v1436_v26 }
 0x3fb   : > { %3973 = vmatprep.mubr.msk.f32.mxu1 %vm937_vm1, %v1728_v63  ;;  %v1740_v4 = vpop.permute.xlu0 %1739 }
 0x3fd   : > { %v1742_v59 = vpop.permute.xlu1 %1741 }
 0x3fe   : > { %3974 = vmatmul.mubr.msk.f32.vlgmr.msra.gmra.mxu1 %vm937_vm1, %v1730_v32 }
 0x3ff   : > { %3976 = vmatprep.mubr.msk.f32.mxu1 %vm937_vm1, %v1732_v35 }
 0x402   : > { %3977 = vmatmul.mubr.msk.f32.gmra.mxu1 %vm937_vm1, %v1734_v33 }
 0x403   : > { %3979 = vmatprep.mubr.msk.f32.mxu1 %vm937_vm1, %v1736_v41 }
 0x406   : > { %3980 = vmatmul.mubr.msk.f32.gmra.mxu1 %vm937_vm1, %v1738_v6 }
 0x407   : > { %3982 = vmatprep.mubr.msk.f32.mxu1 %vm937_vm1, %v1740_v4 }
 0x40a   : > { %3983 = vmatmul.mubr.msk.f32.gmra.mxu1 %vm937_vm1, %v1742_v59 }
 0x42c   : > { %v1094_v34 = vpop.xlane.xlu0 %1093 }
 0x42d   : > { %v1116_v62 = vsub.f32 %v5063_v60, %v1094_v34 }
 0x42e   : > { %v1097_v2 = vpop.xlane.xlu1 %1096 }
 0x42f   : > { %v1124_v8 = vmul.f32 1.442695, %v1116_v62  ;;  %v1117_v58 = vsub.f32 %v5061_v23, %v1097_v2 }
 0x430   : > { %v1100_v46 = vpop.xlane.xlu0 %1099 }
 0x431   : > { %4162 = vpow2.f32 %v1124_v8  ;;  %v1126_v43 = vmul.f32 1.442695, %v1117_v58  ;;  %v1118_v28 = vsub.f32 %v5067_v1, %v1100_v46 }
 0x432   : > { %v1106_v7 = vpop.xlane.xlu1 %1105 }
 0x433   : > { %4164 = vpow2.f32 %v1126_v43  ;;  %v1128_v12 = vmul.f32 1.442695, %v1118_v28  ;;  %v1120_v10 = vsub.f32 %v5071_v9, %v1106_v7 }
 0x434   : > { %v1103_v11 = vpop.xlane.xlu0 %1102 }
 0x435   : > { %4166 = vpow2.f32 %v1128_v12  ;;  %v1132_v16 = vmul.f32 1.442695, %v1120_v10  ;;  %v1119_v17 = vsub.f32 %v5065_v61, %v1103_v11 }
 0x436   : > { %v1112_v60 = vpop.xlane.xlu1 %1111 }
 0x437   : > { %4168 = vpow2.f32 %v1132_v16  ;;  %v1130_v18 = vmul.f32 1.442695, %v1119_v17  ;;  %v1122_v23 = vsub.f32 %v5083_v21, %v1112_v60 }
 0x438   : > { %v1109_v20 = vpop.xlane.xlu0 %1108 }
 0x439   : > { %4170 = vpow2.f32 %v1130_v18  ;;  %v1136_v22 = vmul.f32 1.442695, %v1122_v23  ;;  %v1121_v1 = vsub.f32 %v5069_v3, %v1109_v20 }
 0x43b   : > { %4172 = vpow2.f32 %v1136_v22  ;;  %v1134_v24 = vmul.f32 1.442695, %v1121_v1 }
 0x43c   : > { %v1115_v63 = vpop.xlane.xlu0 %1114 }
 0x43d   : > { %4174 = vpow2.f32 %v1134_v24  ;;  %v1123_v9 = vsub.f32 %v5077_v14, %v1115_v63 }
 0x43e   : > { %v5143_v29 = vpop.eup %4162 }
 0x43f   : > { %v1138_v30 = vmul.f32 1.442695, %v1123_v9  ;;  %v1140_v61 = vsel %vm1091_vm2, %v5143_v29, 0.0 }
 0x440   : > { %v5147_v27 = vpop.eup %4164  ;;  %1141 = vadd.xlane.f32.xlu1 %v1140_v61 }
 0x441   : > { %4176 = vpow2.f32 %v1138_v30  ;;  %v1143_v21 = vsel %vm1091_vm2, %v5147_v27, 0.0 }
 0x442   : > { %v5151_v3 = vpop.eup %4166  ;;  %1144 = vadd.xlane.f32.xlu0 %v1143_v21 }
 0x443   : > { %v1146_v31 = vsel %vm1091_vm2, %v5151_v3, 0.0 }
 0x444   : > { %v5155_v14 = vpop.eup %4168  ;;  %1147 = vadd.xlane.f32.xlu1 %v1146_v31 }
 0x445   : > { %v1152_v35 = vsel %vm1091_vm2, %v5155_v14, 0.0 }
 0x446   : > { %v5157_v32 = vpop.eup %4170 }
 0x447   : > { %v1149_v26 = vsel %vm1091_vm2, %v5157_v32, 0.0 }
 0x448   : > { %v5163_v33 = vpop.eup %4172  ;;  %1150 = vadd.xlane.f32.xlu0 %v1149_v26  ;;  %1153 = vadd.xlane.f32.xlu1 %v1152_v35 }
 0x449   : > { %v1158_v4 = vsel %vm1091_vm2, %v5163_v33, 0.0 }
 0x44a   : > { %v5165_v41 = vpop.eup %4174 }
 0x44b   : > { %v1155_v6 = vsel %vm1091_vm2, %v5165_v41, 0.0 }
 0x44c   : > { %1156 = vadd.xlane.f32.xlu0 %v1155_v6  ;;  %1159 = vadd.xlane.f32.xlu1 %v1158_v4 }
 0x44e   : > { %v5171_v59 = vpop.eup %4176 }
 0x44f   : > { %v1161_v34 = vsel %vm1091_vm2, %v5171_v59, 0.0 }
 0x450   : > { %1162 = vadd.xlane.f32.xlu0 %v1161_v34 }
 0x45d   : > { %1998 = vrot.lane.b32.xlu1 %v4905_v19, %s4364_s25 }
 0x461   : > { %1994 = vrot.lane.b32.xlu1 %v4870_v13, %s4364_s25 }
 0x465   : > { %1992 = vrot.lane.b32.xlu1 %v4887_v15, %s4364_s25 }
 0x466   : > { %1996 = vrot.lane.b32.xlu0 %v4913_v5, %s4364_s25 }
 0x469   : > { %1988 = vrot.lane.b32.xlu1 %v4857_v51, %s4364_s25 }
 0x46a   : > { %1990 = vrot.lane.b32.xlu0 %v4844_v49, %s4364_s25 }
 0x46d   : > { %1984 = vrot.lane.b32.xlu1 %v4827_v54, %s4364_s25 }
 0x46e   : > { %1986 = vrot.lane.b32.xlu0 %v4813_v40, %s4364_s25 }
 0x471   : > { %2173 = vrot.lane.b32.xlu1 %v4801_v44, %s4365_s26 }
 0x472   : > { %2175 = vrot.lane.b32.xlu0 %v4797_v38, %s4365_s26 }
 0x47e   : > { %v5195_v62 = vpop.f32.mrf.mxu1 }
 0x480   : > { %v5197_v2 = vpop.f32.mrf.mxu1 }
 0x4b2   : > { %v5199_v8 = vpop.f32.mrf.mxu1 }
 0x4b4   : > { %v5201_v58 = vpop.f32.mrf.mxu1 }
 0x4b6   : > { %v5203_v46 = vpop.f32.mrf.mxu1 }
 0x4b8   : > { %v5205_v43 = vpop.f32.mrf.mxu1 }
 0x4ba   : > { %v5207_v28 = vpop.f32.mrf.mxu1 }
 0x4bc   : > { %v5209_v7 = vpop.f32.mrf.mxu1 }
 0x4be   : > { %v5211_v44 = vpop.f32.mrf.mxu1 }
 0x4bf   : > { %v1899_v38 = vsel %vm1091_vm2, %v5211_v44, -inf }
 0x4c0   : > { %1900 = vmax.xlane.f32.xlu0 %v1899_v38  ;;  %v5215_v12 = vpop.f32.mrf.mxu1 }
 0x4c1   : > { %v1896_v10 = vsel %vm1091_vm2, %v5215_v12, -inf }
 0x4c2   : > { %v5219_v11 = vpop.f32.mrf.mxu1  ;;  %1897 = vmax.xlane.f32.xlu1 %v1896_v10 }
 0x4c3   : > { %v1905_v16 = vsel %vm1091_vm2, %v5219_v11, -inf }
 0x4c4   : > { %1906 = vmax.xlane.f32.xlu0 %v1905_v16  ;;  %v5223_v17 = vpop.f32.mrf.mxu1 }
 0x4c5   : > { %v1902_v60 = vsel %vm1091_vm2, %v5223_v17, -inf }
 0x4c6   : > { %v5227_v18 = vpop.f32.mrf.mxu1  ;;  %1903 = vmax.xlane.f32.xlu1 %v1902_v60 }
 0x4c7   : > { %v1911_v23 = vsel %vm1091_vm2, %v5227_v18, -inf }
 0x4c8   : > { %1912 = vmax.xlane.f32.xlu0 %v1911_v23  ;;  %v5231_v20 = vpop.f32.mrf.mxu1 }
 0x4c9   : > { %v1142_v22 = vpop.xlane.xlu1 %1141  ;;  %v1908_v1 = vsel %vm1091_vm2, %v5231_v20, -inf }
 0x4ca   : > { %4178 = vrcp.f32 %v1142_v22  ;;  %v5235_v24 = vpop.f32.mrf.mxu1  ;;  %1909 = vmax.xlane.f32.xlu1 %v1908_v1 }
 0x4cb   : > { %v1145_v63 = vpop.xlane.xlu0 %1144  ;;  %v1917_v9 = vsel %vm1091_vm2, %v5235_v24, -inf }
 0x4cc   : > { %4180 = vrcp.f32 %v1145_v63  ;;  %1918 = vmax.xlane.f32.xlu0 %v1917_v9  ;;  %v5239_v30 = vpop.f32.mrf.mxu1 }
 0x4cd   : > { %v1148_v61 = vpop.xlane.xlu1 %1147  ;;  %v1914_v21 = vsel %vm1091_vm2, %v5239_v30, -inf }
 0x4ce   : > { %4182 = vrcp.f32 %v1148_v61  ;;  %1915 = vmax.xlane.f32.xlu1 %v1914_v21 }
 0x4d1   : > { %v1151_v31 = vpop.xlane.xlu0 %1150  ;;  %v1154_v26 = vpop.xlane.xlu1 %1153 }
 0x4d2   : > { %4184 = vrcp.f32 %v1151_v31 }
 0x4d3   : > { %4186 = vrcp.f32 %v1154_v26 }
 0x4d5   : > { %v1157_v35 = vpop.xlane.xlu0 %1156  ;;  %v1160_v6 = vpop.xlane.xlu1 %1159 }
 0x4d6   : > { %4188 = vrcp.f32 %v1157_v35 }
 0x4d7   : > { %v4179_v4 = vpop.eup %4178  ;;  %4190 = vrcp.f32 %v1160_v6 }
 0x4d8   : > { %v1172_v34 = vmul.f32 %v4179_v4, %v5143_v29 }
 0x4d9   : > { %v4181_v38 = vpop.eup %4180  ;;  %v1163_v10 = vpop.xlane.xlu0 %1162 }
 0x4da   : > { %v1999_v16 = vpop.permute.xlu1 %1998  ;;  %v1173_v60 = vmul.f32 %v4181_v38, %v5147_v27  ;;  %4192 = vrcp.f32 %v1163_v10  ;;  %3945 = vmatprep.mubr.msk.f32.mxu0 %vm1091_vm2, %v1172_v34 }
 0x4db   : > { %3985 = vmatprep.subr.mxu0 %v1999_v16  ;;  %v4183_v23 = vpop.eup %4182 }
 0x4dc   : > { %3946 = vmatmul.mubr.msk.f32.vlgmr.msra.gmra.mxu0 %vm1091_vm2, %v1173_v60  ;;  %v1174_v22 = vmul.f32 %v4183_v23, %v5151_v3 }
 0x4dd   : > { %3986 = vmatpush3.msra.mxu0 %v1999_v16  ;;  %v1997_v1 = vpop.permute.xlu0 %1996 }
 0x4de   : > { %v1995_v63 = vpop.permute.xlu1 %1994  ;;  %3948 = vmatprep.mubr.msk.f32.mxu0 %vm1091_vm2, %v1174_v22  ;;  %3987 = vmatprep.subr.mxu0 %v1997_v1 }
 0x4df   : > { %v4185_v29 = vpop.eup %4184  ;;  %2169 = vrot.lane.b32.xlu1 %v4799_v42, %s4365_s26  ;;  %3988 = vmatpush3.msra.mxu0 %v1997_v1 }
 0x4e0   : > { %v4187_v27 = vpop.eup %4186  ;;  %3989 = vmatprep.subr.mxu0 %v1995_v63  ;;  %v1175_v9 = vmul.f32 %v4185_v29, %v5157_v32 }
 0x4e1   : > { %v1991_v61 = vpop.permute.xlu0 %1990  ;;  %3990 = vmatpush3.msra.mxu0 %v1995_v63  ;;  %v1176_v3 = vmul.f32 %v4187_v27, %v5155_v14 }
 0x4e2   : > { %v1993_v21 = vpop.permute.xlu1 %1992  ;;  %2171 = vrot.lane.b32.xlu0 %v4793_v37, %s4365_s26  ;;  %3949 = vmatmul.mubr.msk.f32.gmra.mxu0 %vm1091_vm2, %v1175_v9 }
 0x4e3   : > { %v4189_v31 = vpop.eup %4188  ;;  %3991 = vmatprep.subr.mxu0 %v1993_v21  ;;  %3951 = vmatprep.mubr.msk.f32.mxu0 %vm1091_vm2, %v1176_v3 }
 0x4e4   : > { %v4191_v42 = vpop.eup %4190  ;;  %3992 = vmatpush3.msra.mxu0 %v1993_v21  ;;  %v1177_v26 = vmul.f32 %v4189_v31, %v5165_v41 }
 0x4e5   : > { %3993 = vmatprep.subr.mxu0 %v1991_v61  ;;  %v1178_v35 = vmul.f32 %v4191_v42, %v5163_v33  ;;  %v1987_v6 = vpop.permute.xlu0 %1986 }
 0x4e6   : > { %v1989_v32 = vpop.permute.xlu1 %1988  ;;  %3994 = vmatpush3.msra.mxu0 %v1991_v61 }
 0x4e7   : > { %v4193_v14 = vpop.eup %4192  ;;  %3952 = vmatmul.mubr.msk.f32.gmra.mxu0 %vm1091_vm2, %v1177_v26  ;;  %3995 = vmatprep.subr.mxu0 %v1989_v32 }
 0x4e8   : > { %3954 = vmatprep.mubr.msk.f32.mxu0 %vm1091_vm2, %v1178_v35  ;;  %3996 = vmatpush3.msra.mxu0 %v1989_v32  ;;  %v1179_v37 = vmul.f32 %v4193_v14, %v5171_v59 }
 0x4e9   : > { %3997 = vmatprep.subr.mxu0 %v1987_v6  ;;  %v5263_v41 = vpop.permute.xlu0 %2175 }
 0x4ea   : > { %v1985_v4 = vpop.permute.xlu1 %1984  ;;  %3998 = vmatpush3.msra.mxu0 %v1987_v6 }
 0x4eb   : > { %3955 = vmatmul.mubr.msk.f32.gmra.mxu0 %vm1091_vm2, %v1179_v37  ;;  %3999 = vmatprep.subr.mxu0 %v1985_v4 }
 0x4ec   : > { %4000 = vmatpush3.msra.mxu0 %v1985_v4 }
 0x4ed   : > { %4013 = vmatprep.subr.msk.mxu0 %vm937_vm1, %v5263_v41 }
 0x4ee   : > { %v5267_v33 = vpop.permute.xlu1 %2173 }
 0x549   : > { %v1901_v34 = vpop.xlane.xlu0 %1900 }
 0x54a   : > { %v1921_v38 = vsub.f32 %v5211_v44, %v1901_v34 }
 0x54b   : > { %v1898_v10 = vpop.xlane.xlu1 %1897 }
 0x54c   : > { %v1930_v16 = vmul.f32 1.442695, %v1921_v38  ;;  %v1920_v59 = vsub.f32 %v5215_v12, %v1898_v10 }
 0x54d   : > { %v1907_v12 = vpop.xlane.xlu0 %1906 }
 0x54e   : > { %4194 = vpow2.f32 %v1930_v16  ;;  %v1928_v60 = vmul.f32 1.442695, %v1920_v59  ;;  %v1923_v61 = vsub.f32 %v5219_v11, %v1907_v12 }
 0x54f   : > { %v1904_v44 = vpop.xlane.xlu1 %1903 }
 0x550   : > { %4196 = vpow2.f32 %v1928_v60  ;;  %v1922_v27 = vsub.f32 %v5223_v17, %v1904_v44  ;;  %v1934_v42 = vmul.f32 1.442695, %v1923_v61 }
 0x551   : > { %v1913_v9 = vpop.xlane.xlu0 %1912 }
 0x552   : > { %v1932_v21 = vmul.f32 1.442695, %v1922_v27  ;;  %v1925_v26 = vsub.f32 %v5227_v18, %v1913_v9 }
 0x553   : > { %v1910_v29 = vpop.xlane.xlu1 %1909 }
 0x554   : > { %v1924_v3 = vsub.f32 %v5231_v20, %v1910_v29  ;;  %4198 = vpow2.f32 %v1932_v21 }
 0x555   : > { %v1919_v32 = vpop.xlane.xlu0 %1918  ;;  %4200 = vpow2.f32 %v1934_v42 }
 0x556   : > { %v1927_v6 = vsub.f32 %v5235_v24, %v1919_v32 }
 0x557   : > { %v1916_v31 = vpop.xlane.xlu1 %1915 }
 0x558   : > { %v1926_v35 = vsub.f32 %v5239_v30, %v1916_v31  ;;  %v1942_v11 = vmul.f32 1.442695, %v1927_v6 }
 0x55a   : > { %v1940_v17 = vmul.f32 1.442695, %v1926_v35 }
 0x55b   : > { %v5271_v23 = vpop.eup %4194 }
 0x55c   : > { %v1947_v22 = vsel %vm1091_vm2, %v5271_v23, 0.0 }
 0x55d   : > { %v5275_v1 = vpop.eup %4196  ;;  %1948 = vadd.xlane.f32.xlu0 %v1947_v22 }
 0x55e   : > { %v1944_v63 = vsel %vm1091_vm2, %v5275_v1, 0.0 }
 0x55f   : > { %1945 = vadd.xlane.f32.xlu1 %v1944_v63 }
 0x561   : > { %v5289_v20 = vpop.eup %4198 }
 0x562   : > { %v5291_v14 = vpop.eup %4200  ;;  %v1950_v18 = vsel %vm1091_vm2, %v5289_v20, 0.0 }
 0x563   : > { %v1953_v30 = vsel %vm1091_vm2, %v5291_v14, 0.0 }
 0x570   : > { %2165 = vrot.lane.b32.xlu1 %v4815_v45, %s4365_s26  ;;  %v1936_v45 = vmul.f32 1.442695, %v1924_v3 }
 0x572   : > { %4202 = vpow2.f32 %v1936_v45 }
 0x573   : > { %2167 = vrot.lane.b32.xlu0 %v4823_v47, %s4365_s26  ;;  %v1938_v47 = vmul.f32 1.442695, %v1925_v26 }
 0x575   : > { %4204 = vpow2.f32 %v1938_v47 }
 0x576   : > { %4206 = vpow2.f32 %v1940_v17 }
 0x577   : > { %4208 = vpow2.f32 %v1942_v11 }
 0x57f   : > { %v5295_v37 = vpop.eup %4202 }
 0x580   : > { %v1956_v4 = vsel %vm1091_vm2, %v5295_v37, 0.0 }
 0x582   : > { %v5299_v24 = vpop.eup %4204 }
 0x583   : > { %v5303_v34 = vpop.eup %4206  ;;  %v1959_v38 = vsel %vm1091_vm2, %v5299_v24, 0.0 }
 0x584   : > { %v5307_v10 = vpop.eup %4208  ;;  %v1962_v16 = vsel %vm1091_vm2, %v5303_v34, 0.0 }
 0x585   : > { %v1965_v59 = vsel %vm1091_vm2, %v5307_v10, 0.0 }
 0x592   : > { %1951 = vadd.xlane.f32.xlu0 %v1950_v18 }
 0x594   : > { %1954 = vadd.xlane.f32.xlu1 %v1953_v30 }
 0x596   : > { %1957 = vadd.xlane.f32.xlu0 %v1956_v4 }
 0x598   : > { %1960 = vadd.xlane.f32.xlu1 %v1959_v38 }
 0x59a   : > { %1963 = vadd.xlane.f32.xlu0 %v1962_v16 }
 0x59c   : > { %1966 = vadd.xlane.f32.xlu1 %v1965_v59 }
 0x5ad   : > { %2161 = vrot.lane.b32.xlu1 %v4829_v39, %s4365_s26  ;;  %v2172_v39 = vpop.permute.xlu0 %2171 }
 0x5b0   : > { %2163 = vrot.lane.b32.xlu0 %v4840_v48, %s4365_s26 }
 0x5b1   : > { %2147 = vrot.lane.b32.xlu1 %v4834_v0, %s4365_s26 }
 0x5b4   : > { %2145 = vrot.lane.b32.xlu0 %v4785_v25, %s4365_s26  ;;  %v2170_v25 = vpop.permute.xlu1 %2169 }
 0x5b5   : > { %2151 = vrot.lane.b32.xlu1 %v4849_v50, %s4365_s26 }
 0x5b8   : > { %2149 = vrot.lane.b32.xlu0 %v4860_v52, %s4365_s26 }
 0x5b9   : > { %2155 = vrot.lane.b32.xlu1 %v4873_v53, %s4365_s26 }
 0x5bc   : > { %2153 = vrot.lane.b32.xlu0 %v4883_v55, %s4365_s26 }
 0x5bd   : > { %2159 = vrot.lane.b32.xlu1 %v4891_v56, %s4365_s26 }
 0x5c0   : > { %2157 = vrot.lane.b32.xlu0 %v4901_v57, %s4365_s26 }
 0x5e6   : > { %v1949_v0 = vpop.xlane.xlu0 %1948 }
 0x5e7   : > { %4210 = vrcp.f32 %v1949_v0 }
 0x5e8   : > { %v1946_v48 = vpop.xlane.xlu1 %1945 }
 0x5e9   : > { %4212 = vrcp.f32 %v1946_v48 }
 0x5ea   : > { %v2168_v55 = vpop.permute.xlu0 %2167 }
 0x5ec   : > { %v2166_v56 = vpop.permute.xlu1 %2165 }
 0x5f4   : > { %v4211_v50 = vpop.eup %4210 }
 0x5f5   : > { %v1977_v53 = vmul.f32 %v4211_v50, %v5271_v23 }
 0x5f6   : > { %v4213_v52 = vpop.eup %4212 }
 0x5f7   : > { %v1976_v60 = vmul.f32 %v4213_v52, %v5275_v1 }
 0x5f9   : > { %4001 = vmatprep.mubr.msk.f32.mxu0 %vm1091_vm2, %v1976_v60 }
 0x5fa   : > { %4002 = vmatmul.mubr.msk.f32.vlgmr.msra.gmra.mxu0 %vm1091_vm2, %v1977_v53 }
 0x5fb   : > { %4014 = vmatpush3.xpose.msk.msra.mxu0 %vm937_vm1, %v5263_v41 }
 0x5fc   : > { %4015 = vmatprep.subr.msk.mxu0 %vm937_vm1, %v5267_v33 }
 0x5ff   : > { %4016 = vmatpush3.xpose.msk.msra.mxu0 %vm937_vm1, %v5267_v33 }
 0x600   : > { %4017 = vmatprep.subr.msk.mxu0 %vm937_vm1, %v2172_v39 }
 0x603   : > { %4018 = vmatpush3.xpose.msk.msra.mxu0 %vm937_vm1, %v2172_v39 }
 0x604   : > { %4019 = vmatprep.subr.msk.mxu0 %vm937_vm1, %v2170_v25 }
 0x607   : > { %4020 = vmatpush3.xpose.msk.msra.mxu0 %vm937_vm1, %v2170_v25 }
 0x608   : > { %4021 = vmatprep.subr.msk.mxu0 %vm937_vm1, %v2168_v55 }
 0x60b   : > { %4022 = vmatpush3.xpose.msk.msra.mxu0 %vm937_vm1, %v2168_v55 }
 0x60c   : > { %4023 = vmatprep.subr.msk.mxu0 %vm937_vm1, %v2166_v56 }
 0x60f   : > { %4024 = vmatpush3.xpose.msk.msra.mxu0 %vm937_vm1, %v2166_v56 }
 0x61b   : > { %v1952_v57 = vpop.xlane.xlu0 %1951 }
 0x61c   : > { %4214 = vrcp.f32 %v1952_v57 }
 0x61d   : > { %v1955_v41 = vpop.xlane.xlu1 %1954 }
 0x61e   : > { %4216 = vrcp.f32 %v1955_v41 }
 0x61f   : > { %v1958_v33 = vpop.xlane.xlu0 %1957 }
 0x620   : > { %4218 = vrcp.f32 %v1958_v33 }
 0x621   : > { %v1961_v23 = vpop.xlane.xlu1 %1960 }
 0x622   : > { %4220 = vrcp.f32 %v1961_v23 }
 0x623   : > { %v1964_v22 = vpop.xlane.xlu0 %1963 }
 0x624   : > { %4222 = vrcp.f32 %v1964_v22 }
 0x625   : > { %v1967_v1 = vpop.xlane.xlu1 %1966 }
 0x626   : > { %4224 = vrcp.f32 %v1967_v1 }
 0x627   : > { %v2164_v63 = vpop.permute.xlu0 %2163 }
 0x628   : > { %4025 = vmatprep.subr.msk.mxu0 %vm937_vm1, %v2164_v63 }
 0x629   : > { %v4215_v44 = vpop.eup %4214  ;;  %4026 = vmatpush3.xpose.msk.msra.mxu0 %vm937_vm1, %v2164_v63  ;;  %v2162_v12 = vpop.permute.xlu1 %2161 }
 0x62a   : > { %4027 = vmatprep.subr.msk.mxu0 %vm937_vm1, %v2162_v12  ;;  %v1978_v29 = vmul.f32 %v4215_v44, %v5289_v20 }
 0x62b   : > { %v4217_v27 = vpop.eup %4216  ;;  %v2146_v31 = vpop.permute.xlu0 %2145 }
 0x62c   : > { %4004 = vmatprep.mubr.msk.f32.mxu0 %vm1091_vm2, %v1978_v29  ;;  %v1979_v9 = vmul.f32 %v4217_v27, %v5291_v14 }
 0x62d   : > { %v4219_v61 = vpop.eup %4218  ;;  %4028 = vmatpush3.xpose.msk.msra.mxu0 %vm937_vm1, %v2162_v12  ;;  %v2148_v35 = vpop.permute.xlu1 %2147 }
 0x62e   : > { %4005 = vmatmul.mubr.msk.f32.gmra.mxu0 %vm1091_vm2, %v1979_v9  ;;  %v1980_v21 = vmul.f32 %v4219_v61, %v5295_v37  ;;  %v3947_v37 = vpop.f32.mrf.mxu0 }
 0x62f   : > { %v4221_v3 = vpop.eup %4220  ;;  %v2150_v6 = vpop.permute.xlu0 %2149  ;;  %v1694_v59 = vadd.f32 %v3947_v37, %v5195_v62 }
 0x630   : > { %4007 = vmatprep.mubr.msk.f32.mxu0 %vm1091_vm2, %v1980_v21  ;;  %v1981_v42 = vmul.f32 %v4221_v3, %v5299_v24  ;;  %v1688_v30 = vpop.f32.mrf.mxu0 }
 0x631   : > { %v4223_v26 = vpop.eup %4222  ;;  %v2152_v17 = vpop.permute.xlu1 %2151  ;;  %v1689_v25 = vadd.f32 %v1688_v30, %v5197_v2 }
 0x632   : > { %4008 = vmatmul.mubr.msk.f32.gmra.mxu0 %vm1091_vm2, %v1981_v42  ;;  %v1982_v32 = vmul.f32 %v4223_v26, %v5303_v34  ;;  %v3950_v24 = vpop.f32.mrf.mxu0 }
 0x633   : > { %v4225_v45 = vpop.eup %4224  ;;  %v2154_v11 = vpop.permute.xlu0 %2153  ;;  %v1704_v52 = vadd.f32 %v3950_v24, %v5199_v8 }
 0x634   : > { %4010 = vmatprep.mubr.msk.f32.mxu0 %vm1091_vm2, %v1982_v32  ;;  %v1983_v47 = vmul.f32 %v4225_v45, %v5307_v10  ;;  %v1698_v4 = vpop.f32.mrf.mxu0 }
 0x635   : > { %v2156_v20 = vpop.permute.xlu1 %2155  ;;  %v1699_v53 = vadd.f32 %v1698_v4, %v5201_v58 }
 0x636   : > { %4011 = vmatmul.mubr.msk.f32.gmra.mxu0 %vm1091_vm2, %v1983_v47  ;;  %v3953_v34 = vpop.f32.mrf.mxu0 }
 0x637   : > { %4029 = vmatprep.mubr.msk.f32.mxu0 %vm937_vm1, %v2146_v31  ;;  %v2158_v14 = vpop.permute.xlu0 %2157  ;;  %v1714_v57 = vadd.f32 %v3953_v34, %v5203_v46 }
 0x638   : > { %v1708_v38 = vpop.f32.mrf.mxu0 }
 0x639   : > { %v2160_v18 = vpop.permute.xlu1 %2159  ;;  %v1709_v2 = vadd.f32 %v1708_v38, %v5205_v43 }
 0x63a   : > { %4030 = vmatmul.mubr.msk.f32.vlgmr.msra.gmra.mxu0 %vm937_vm1, %v2148_v35  ;;  %v3956_v10 = vpop.f32.mrf.mxu0 }
 0x63b   : > { %4032 = vmatprep.mubr.msk.f32.mxu0 %vm937_vm1, %v2150_v6  ;;  %v1724_v22 = vadd.f32 %v3956_v10, %v5207_v28 }
 0x63c   : > { %v5375_v16 = vpop.f32.mrf.mxu0 }
 0x63e   : > { %4033 = vmatmul.mubr.msk.f32.gmra.mxu0 %vm937_vm1, %v2152_v17 }
 0x63f   : > { %4035 = vmatprep.mubr.msk.f32.mxu0 %vm937_vm1, %v2154_v11 }
 0x642   : > { %4036 = vmatmul.mubr.msk.f32.gmra.mxu0 %vm937_vm1, %v2156_v20 }
 0x643   : > { %4038 = vmatprep.mubr.msk.f32.mxu0 %vm937_vm1, %v2158_v14 }
 0x646   : > { %4039 = vmatmul.mubr.msk.f32.gmra.mxu0 %vm937_vm1, %v2160_v18 }
 0x6ba   : > { %v4003_v39 = vpop.f32.mrf.mxu0 }
 0x6bb   : > { %v5379_v0 = vadd.f32 %v4003_v39, %v1694_v59 }
 0x6bc   : > { %v2098_v48 = vpop.f32.mrf.mxu0 }
 0x6bd   : > { %v5381_v50 = vadd.f32 %v2098_v48, %v1689_v25 }
 0x6ee   : > { %v4006_v60 = vpop.f32.mrf.mxu0 }
 0x6ef   : > { %v5385_v55 = vadd.f32 %v4006_v60, %v1704_v52 }
 0x6f0   : > { %v2108_v56 = vpop.f32.mrf.mxu0 }
 0x6f1   : > { %v5388_v41 = vadd.f32 %v2108_v56, %v1699_v53 }
 0x6f2   : > { %v4009_v62 = vpop.f32.mrf.mxu0 }
 0x6f3   : > { %v5391_v33 = vadd.f32 %v4009_v62, %v1714_v57 }
 0x6f4   : > { %v2118_v23 = vpop.f32.mrf.mxu0 }
 0x6f5   : > { %v5394_v1 = vadd.f32 %v2118_v23, %v1709_v2 }
 0x6f6   : > { %v4012_v8 = vpop.f32.mrf.mxu0 }
 0x6f7   : > { %v5396_v63 = vadd.f32 %v4012_v8, %v1724_v22 }
 0x6f8   : > { %v5398_v58 = vpop.f32.mrf.mxu0 }
 0x6fa   : > { %v4031_v44 = vpop.f32.mrf.mxu0 }
 0x6fb   : > { %v2317_v46 = vsel %vm1091_vm2, %v4031_v44, -inf }
 0x6fc   : > { %2318 = vmax.xlane.f32.xlu1 %v2317_v46  ;;  %v2275_v12 = vpop.f32.mrf.mxu0 }
 0x6fd   : > { %v2314_v29 = vsel %vm1091_vm2, %v2275_v12, -inf }
 0x6fe   : > { %2315 = vmax.xlane.f32.xlu0 %v2314_v29  ;;  %v4034_v43 = vpop.f32.mrf.mxu0 }
 0x6ff   : > { %v2323_v21 = vsel %vm1091_vm2, %v4034_v43, -inf }
 0x700   : > { %v2285_v27 = vpop.f32.mrf.mxu0 }
 0x701   : > { %v2320_v9 = vsel %vm1091_vm2, %v2285_v27, -inf }
 0x702   : > { %2321 = vmax.xlane.f32.xlu0 %v2320_v9  ;;  %v4037_v28 = vpop.f32.mrf.mxu0 }
 0x703   : > { %v2329_v31 = vsel %vm1091_vm2, %v4037_v28, -inf }
 0x704   : > { %v2295_v61 = vpop.f32.mrf.mxu0 }
 0x705   : > { %v2326_v3 = vsel %vm1091_vm2, %v2295_v61, -inf }
 0x706   : > { %2324 = vmax.xlane.f32.xlu0 %v2323_v21  ;;  %2327 = vmax.xlane.f32.xlu1 %v2326_v3  ;;  %v4040_v42 = vpop.f32.mrf.mxu0 }
 0x707   : > { %v2335_v26 = vsel %vm1091_vm2, %v4040_v42, -inf }
 0x708   : > { %v5415_v32 = vpop.f32.mrf.mxu0 }
 0x709   : > { %v2332_v45 = vsel %vm1091_vm2, %v5415_v32, -inf }
 0x70a   : > { %2330 = vmax.xlane.f32.xlu0 %v2329_v31 }
 0x70e   : > { %2336 = vmax.xlane.f32.xlu0 %v2335_v26 }
 0x717   : > { %2416 = vrot.lane.b32.xlu1 %v4905_v19, %s4366_s10 }
 0x71b   : > { %2412 = vrot.lane.b32.xlu1 %v4870_v13, %s4366_s10 }
 0x724   : > { %2414 = vrot.lane.b32.xlu0 %v4913_v5, %s4366_s10 }
 0x728   : > { %2408 = vrot.lane.b32.xlu0 %v4844_v49, %s4366_s10 }
 0x73f   : > { %2333 = vmax.xlane.f32.xlu1 %v2332_v45 }
 0x750   : > { %2410 = vrot.lane.b32.xlu1 %v4887_v15, %s4366_s10 }
 0x754   : > { %2406 = vrot.lane.b32.xlu1 %v4857_v51, %s4366_s10 }
 0x785   : > { %v2319_v19 = vpop.xlane.xlu1 %2318 }
 0x786   : > { %v2339_v13 = vsub.f32 %v4031_v44, %v2319_v19 }
 0x787   : > { %v2316_v35 = vpop.xlane.xlu0 %2315 }
 0x788   : > { %v2348_v47 = vmul.f32 1.442695, %v2339_v13  ;;  %v2338_v5 = vsub.f32 %v2275_v12, %v2316_v35 }
 0x78a   : > { %4226 = vpow2.f32 %v2348_v47  ;;  %v2346_v6 = vmul.f32 1.442695, %v2338_v5 }
 0x78b   : > { %v2322_v49 = vpop.xlane.xlu0 %2321 }
 0x78c   : > { %4228 = vpow2.f32 %v2346_v6  ;;  %v2340_v17 = vsub.f32 %v2285_v27, %v2322_v49 }
 0x78e   : > { %v2350_v11 = vmul.f32 1.442695, %v2340_v17 }
 0x78f   : > { %v2325_v20 = vpop.xlane.xlu0 %2324  ;;  %v2328_v14 = vpop.xlane.xlu1 %2327 }
 0x790   : > { %4230 = vpow2.f32 %v2350_v11  ;;  %v2341_v18 = vsub.f32 %v4034_v43, %v2325_v20  ;;  %v2342_v37 = vsub.f32 %v2295_v61, %v2328_v14 }
 0x792   : > { %v2352_v15 = vmul.f32 1.442695, %v2341_v18  ;;  %v2354_v30 = vmul.f32 1.442695, %v2342_v37 }
 0x793   : > { %v2331_v24 = vpop.xlane.xlu0 %2330  ;;  %v2417_v51 = vpop.permute.xlu1 %2416 }
 0x794   : > { %4232 = vpow2.f32 %v2352_v15  ;;  %v2343_v4 = vsub.f32 %v4037_v28, %v2331_v24  ;;  %4041 = vmatprep.subr.mxu1 %v2417_v51 }
 0x795   : > { %4234 = vpow2.f32 %v2354_v30  ;;  %4042 = vmatpush3.msra.mxu1 %v2417_v51 }
 0x796   : > { %v2356_v34 = vmul.f32 1.442695, %v2343_v4 }
 0x797   : > { %v5423_v38 = vpop.eup %4226  ;;  %v2337_v10 = vpop.xlane.xlu0 %2336 }
 0x798   : > { %4236 = vpow2.f32 %v2356_v34  ;;  %v2345_v59 = vsub.f32 %v4040_v42, %v2337_v10  ;;  %v2365_v39 = vsel %vm1091_vm2, %v5423_v38, 0.0  ;;  %v2413_v56 = vpop.permute.xlu1 %2412 }
 0x799   : > { %v4229_v25 = vpop.eup %4228  ;;  %2366 = vadd.xlane.f32.xlu0 %v2365_v39  ;;  %v4290_v39 = vld [vmem:[%s5919_s2] sm:$0xff] }
 0x79a   : > { %v2360_v48 = vmul.f32 1.442695, %v2345_v59  ;;  %v2362_v52 = vsel %vm1091_vm2, %v4229_v25, 0.0 }
 0x79b   : > { %v2415_v60 = vpop.permute.xlu0 %2414  ;;  %2363 = vadd.xlane.f32.xlu1 %v2362_v52  ;;  %v4291_v52 = vld [vmem:[%s4482_s13 + $0x8] sm:$0xff] }
 0x79c   : > { %4238 = vpow2.f32 %v2360_v48  ;;  %4043 = vmatprep.subr.mxu1 %v2415_v60 }
 0x79d   : > { %v5428_v53 = vpop.eup %4230  ;;  %4044 = vmatpush3.msra.mxu1 %v2415_v60 }
 0x79e   : > { %4045 = vmatprep.subr.mxu1 %v2413_v56  ;;  %v2368_v57 = vsel %vm1091_vm2, %v5428_v53, 0.0 }
 0x79f   : > { %2369 = vadd.xlane.f32.xlu1 %v2368_v57  ;;  %4046 = vmatpush3.msra.mxu1 %v2413_v56  ;;  %v2409_v28 = vpop.permute.xlu0 %2408 }
 0x7a1   : > { %v5432_v62 = vpop.eup %4232 }
 0x7a2   : > { %v5434_v2 = vpop.eup %4234  ;;  %v2371_v23 = vsel %vm1091_vm2, %v5432_v62, 0.0 }
 0x7a3   : > { %2372 = vadd.xlane.f32.xlu0 %v2371_v23  ;;  %v2374_v22 = vsel %vm1091_vm2, %v5434_v2, 0.0 }
 0x7a4   : > { %2375 = vadd.xlane.f32.xlu1 %v2374_v22 }
 0x7a5   : > { %v5440_v8 = vpop.eup %4236 }
 0x7a6   : > { %v2377_v44 = vsel %vm1091_vm2, %v5440_v8, 0.0 }
 0x7a7   : > { %2378 = vadd.xlane.f32.xlu0 %v2377_v44  ;;  %v4293_v44 = vld [vmem:[%s4482_s13 + $0x18] sm:$0xff] }
 0x7a9   : > { %v5444_v46 = vpop.eup %4238 }
 0x7aa   : > { %v2383_v12 = vsel %vm1091_vm2, %v5444_v46, 0.0 }
 0x7ab   : > { %2384 = vadd.xlane.f32.xlu0 %v2383_v12 }
 0x7c1   : > { %2404 = vrot.lane.b32.xlu0 %v4813_v40, %s4366_s10 }
 0x7c8   : > { %v2334_v29 = vpop.xlane.xlu1 %2333 }
 0x7c9   : > { %v2344_v43 = vsub.f32 %v5415_v32, %v2334_v29 }
 0x7cb   : > { %v2358_v27 = vmul.f32 1.442695, %v2344_v43 }
 0x7cc   : > { %v2411_v9 = vpop.permute.xlu1 %2410 }
 0x7cd   : > { %4240 = vpow2.f32 %v2358_v27  ;;  %4047 = vmatprep.subr.mxu1 %v2411_v9  ;;  %v4294_v27 = vld [vmem:[%s4482_s13 + $0x10] sm:$0xff] }
 0x7ce   : > { %4048 = vmatpush3.msra.mxu1 %v2411_v9 }
 0x7cf   : > { %4049 = vmatprep.subr.mxu1 %v2409_v28 }
 0x7d0   : > { %4050 = vmatpush3.msra.mxu1 %v2409_v28  ;;  %v2407_v61 = vpop.permute.xlu1 %2406 }
 0x7d1   : > { %4051 = vmatprep.subr.mxu1 %v2407_v61 }
 0x7d2   : > { %4052 = vmatpush3.msra.mxu1 %v2407_v61  ;;  %v1719_v61 = vadd.f32 %v5375_v16, %v5209_v7 }
 0x7da   : > { %v4241_v21 = vpop.eup %4240 }
 0x7db   : > { %v2380_v3 = vsel %vm1091_vm2, %v4241_v21, 0.0 }
 0x7dc   : > { %2381 = vadd.xlane.f32.xlu1 %v2380_v3 }
 0x7ed   : > { %2402 = vrot.lane.b32.xlu1 %v4827_v54, %s4366_s10 }
 0x822   : > { %v2367_v31 = vpop.xlane.xlu0 %2366 }
 0x824   : > { %v2364_v40 = vpop.xlane.xlu1 %2363 }
 0x825   : > { %4242 = vrcp.f32 %v2364_v40  ;;  %v4295_v40 = vld [vmem:[%s4482_s13 + $0x28] sm:$0xff] }
 0x826   : > { %4244 = vrcp.f32 %v2367_v31 }
 0x828   : > { %v2370_v35 = vpop.xlane.xlu1 %2369 }
 0x829   : > { %4246 = vrcp.f32 %v2370_v35 }
 0x82c   : > { %v2373_v42 = vpop.xlane.xlu0 %2372 }
 0x82d   : > { %v2376_v47 = vpop.xlane.xlu1 %2375  ;;  %4248 = vrcp.f32 %v2373_v42 }
 0x82e   : > { %4250 = vrcp.f32 %v2376_v47 }
 0x830   : > { %v2379_v26 = vpop.xlane.xlu0 %2378 }
 0x831   : > { %4252 = vrcp.f32 %v2379_v26  ;;  %v2143_v26 = vadd.f32 %v5398_v58, %v1719_v61 }
 0x832   : > { %v4243_v32 = vpop.eup %4242 }
 0x833   : > { %v2394_v45 = vmul.f32 %v4243_v32, %v4229_v25  ;;  %v4245_v5 = vpop.eup %4244 }
 0x834   : > { %v2385_v19 = vpop.xlane.xlu0 %2384  ;;  %v2395_v17 = vmul.f32 %v4245_v5, %v5423_v38  ;;  %v2573_v38 = vsub.s32 6, %v4637_v36 }
 0x835   : > { %4057 = vmatprep.mubr.msk.f32.mxu1 %vm1091_vm2, %v2394_v45  ;;  %4254 = vrcp.f32 %v2385_v19 }
 0x836   : > { %v4247_v6 = vpop.eup %4246  ;;  %v2574_v25 = vrot.slane %v4290_v39, %v2573_v38  ;;  %v4368_v38 = vmov 1934713408  }
 0x837   : > { %v2396_v20 = vmul.f32 %v4247_v6, %v5428_v53  ;;  %v4298_v6 = vld [vmem:[%s4482_s13 + $0x30] sm:$0xff] }
 0x838   : > { %v2405_v13 = vpop.permute.xlu0 %2404 }
 0x839   : > { %4053 = vmatprep.subr.mxu1 %v2405_v13 }
 0x83a   : > { %4054 = vmatpush3.msra.mxu1 %v2405_v13  ;;  %v4249_v11 = vpop.eup %4248  ;;  %v4297_v13 = vld [vmem:[%s4482_s13 + $0x38] sm:$0xff] }
 0x83b   : > { %v4251_v14 = vpop.eup %4250  ;;  %v2397_v18 = vmul.f32 %v4249_v11, %v5432_v62  ;;  %v4292_v62 = vld [vmem:[%s4482_s13] sm:$0xff] }
 0x83c   : > { %v2398_v15 = vmul.f32 %v4251_v14, %v5434_v2 }
 0x83e   : > { %v4253_v37 = vpop.eup %4252 }
 0x83f   : > { %v2399_v24 = vmul.f32 %v4253_v37, %v5440_v8 }
 0x842   : > { %v4255_v30 = vpop.eup %4254 }
 0x843   : > { %v2401_v34 = vmul.f32 %v4255_v30, %v5444_v46  ;;  %v4367_v30 = vmov 1983009808  }
 0x865   : > { %v2382_v54 = vpop.xlane.xlu1 %2381 }
 0x866   : > { %4256 = vrcp.f32 %v2382_v54 }
 0x869   : > { %v2403_v49 = vpop.permute.xlu1 %2402 }
 0x86a   : > { %4055 = vmatprep.subr.mxu1 %v2403_v49 }
 0x86b   : > { %4056 = vmatpush3.msra.mxu1 %v2403_v49 }
 0x86c   : > { %4058 = vmatmul.mubr.msk.f32.vlgmr.msra.gmra.mxu1 %vm1091_vm2, %v2395_v17 }
 0x86d   : > { %4060 = vmatprep.mubr.msk.f32.mxu1 %vm1091_vm2, %v2396_v20 }
 0x870   : > { %4061 = vmatmul.mubr.msk.f32.gmra.mxu1 %vm1091_vm2, %v2397_v18 }
 0x871   : > { %4063 = vmatprep.mubr.msk.f32.mxu1 %vm1091_vm2, %v2398_v15 }
 0x873   : > { %v4257_v51 = vpop.eup %4256 }
 0x874   : > { %4064 = vmatmul.mubr.msk.f32.gmra.mxu1 %vm1091_vm2, %v2399_v24  ;;  %v2400_v4 = vmul.f32 %v4257_v51, %v4241_v21  ;;  %v2641_v24 = vunpack.c.l.s4 %v4367_v30 }
 0x876   : > { %4066 = vmatprep.mubr.msk.f32.mxu1 %vm1091_vm2, %v2400_v4 }
 0x878   : > { %4067 = vmatmul.mubr.msk.f32.gmra.mxu1 %vm1091_vm2, %v2401_v34 }
 0x92c   : > { %v4059_v10 = vpop.f32.mrf.mxu1 }
 0x92d   : > { %v2556_v59 = vadd.f32 %v4059_v10, %v5379_v0  ;;  %v2656_v10 = vunpack.c.l.s4 %v4368_v38 }
 0x92e   : > { %v2516_v48 = vpop.f32.mrf.mxu1 }
 0x92f   : > { %v2564_v60 = vadd.f32 %v4291_v52, %v2556_v59  ;;  %v2555_v53 = vadd.f32 %v2516_v48, %v5381_v50 }
 0x930   : > { %v4062_v56 = vpop.f32.mrf.mxu1 }
 0x931   : > { %v5475_v57 = vadd.f32 %v2574_v25, %v2564_v60  ;;  %v2563_v2 = vadd.f32 %v4292_v62, %v2555_v53  ;;  %v2558_v23 = vadd.f32 %v4062_v56, %v5385_v55  ;;  %v2657_v56 = vunpack.c.0.s8 %v2656_v10 }
 0x932   : > { %v2526_v22 = vpop.f32.mrf.mxu1 }
 0x933   : > { %v3606_v0 = vmul.f32 -1.442695, %v5475_v57  ;;  %v5480_v8 = vadd.f32 %v2574_v25, %v2563_v2  ;;  %v2566_v46 = vadd.f32 %v4293_v44, %v2558_v23  ;;  %v2557_v12 = vadd.f32 %v2526_v22, %v5388_v41 }
 0x934   : > { %v4065_v29 = vpop.f32.mrf.mxu1 }
 0x935   : > { %4258 = vpow2.f32 %v3606_v0  ;;  %v3605_v50 = vmul.f32 -1.442695, %v5480_v8  ;;  %v5485_v43 = vadd.f32 %v2574_v25, %v2566_v46  ;;  %v2565_v9 = vadd.f32 %v4294_v27, %v2557_v12 }
 0x936   : > { %v2560_v55 = vadd.f32 %v4065_v29, %v5391_v33  ;;  %v2536_v28 = vpop.f32.mrf.mxu1  ;;  %v4296_v33 = vld [vmem:[%s4482_s13 + $0x20] sm:$0xff]  ;;  %v5519_v46 = vsub.s32 %v2657_v56, %v4637_v36  ;;  %v4369_v12 = vmov 0.0   ;;  %s311_s13 = sand.u32 1, %s4351_s28  }
 0x937   : > { %4260 = vpow2.f32 %v3605_v50  ;;  %v3608_v21 = vmul.f32 -1.442695, %v5485_v43  ;;  %v2559_v41 = vadd.f32 %v2536_v28, %v5394_v1  ;;  %v5493_v3 = vadd.f32 %v2574_v25, %v2565_v9  ;;  %s3480_s18 = sshll.u32 %s311_s13, 4 }
 0x938   : > { %v2568_v31 = vadd.f32 %v4295_v40, %v2560_v55  ;;  %v4068_v42 = vpop.f32.mrf.mxu1  ;;  %s5836_s19 = scalar_lea.vmem [#allocation2], %s3480_s18 }
 0x939   : > { %4262 = vpow2.f32 %v3608_v21  ;;  %v2567_v32 = vadd.f32 %v4296_v33, %v2559_v41  ;;  %v2562_v45 = vadd.f32 %v4068_v42, %v5396_v63  ;;  %v3607_v47 = vmul.f32 -1.442695, %v5493_v3  ;;  %s3405_s21 = sshll.u32 %s5836_s19, 4  ;;  %s3406_s21 = int_to_ptr.vmem [resolvable:$true] %s3405_s21 }
 0x93a   : > { %v5499_v7 = vadd.f32 %v2574_v25, %v2568_v31  ;;  %v2546_v16 = vpop.f32.mrf.mxu1  ;;  %s4299_s26 = scalar_lea.vmem %s3406_s21, 256 }
 0x93b   : > { %v5501_v19 = vadd.f32 %v2574_v25, %v2567_v32  ;;  %v2570_v1 = vadd.f32 %v4297_v13, %v2562_v45  ;;  %v2561_v35 = vadd.f32 %v2546_v16, %v2143_v26  ;;  %p4300_p11 = scmp.ne.s32.totalorder %s3406_s21, %s4299_s26 }
 0x93c   : > { %v3610_v54 = vmul.f32 -1.442695, %v5499_v7 }
 0x93d   : > { %v3609_v5 = vmul.f32 -1.442695, %v5501_v19  ;;  %v5507_v58 = vadd.f32 %v2574_v25, %v2570_v1  ;;  %v2569_v49 = vadd.f32 %v4298_v6, %v2561_v35  ;;  %p4301_p12 = pnand %p4300_p11, %p4455_p5 }
 0x93e   : > { %4264 = vpow2.f32 %v3610_v54 }
 0x93f   : > { %4266 = vpow2.f32 %v3609_v5  ;;  %v3612_v63 = vmul.f32 -1.442695, %v5507_v58  ;;  %v5511_v17 = vadd.f32 %v2574_v25, %v2569_v49  ;;  %v2642_v25 = vunpack.c.0.s8 %v2641_v24  ;;  %p4302_p13 = pneg %p4301_p12 }
 0x940   : > { %4268 = vpow2.f32 %v3607_v47 }
 0x941   : > { %4270 = vpow2.f32 %v3612_v63  ;;  %v3611_v11 = vmul.f32 -1.442695, %v5511_v17  ;;  %v5515_v62 = vsub.s32 %v2642_v25, %v4637_v36 }
 0x942   : > { %v4259_v20 = vpop.eup %4258 }
 0x943   : > { %v2608_v14 = vadd.f32 1.0, %v4259_v20  ;;  %4272 = vpow2.f32 %v3611_v11 }
 0x944   : > { %v4261_v18 = vpop.eup %4260 }
 0x945   : > { %4274 = vrcp.f32 %v2608_v14  ;;  %v2607_v37 = vadd.f32 1.0, %v4261_v18 }
 0x946   : > { %v4263_v15 = vpop.eup %4262 }
 0x947   : > { %4276 = vrcp.f32 %v2607_v37  ;;  %v2610_v51 = vadd.f32 1.0, %v4263_v15 }
 0x949   : > { %4278 = vrcp.f32 %v2610_v51 }
 0x94b   : > { %v4265_v4 = vpop.eup %4264 }
 0x94c   : > { %v4267_v34 = vpop.eup %4266  ;;  %v2612_v59 = vadd.f32 1.0, %v4265_v4 }
 0x94d   : > { %v4269_v39 = vpop.eup %4268  ;;  %v2611_v48 = vadd.f32 1.0, %v4267_v34 }
 0x94e   : > { %v4271_v52 = vpop.eup %4270  ;;  %4280 = vrcp.f32 %v2612_v59  ;;  %v2609_v2 = vadd.f32 1.0, %v4269_v39 }
 0x94f   : > { %4282 = vrcp.f32 %v2611_v48  ;;  %v2614_v60 = vadd.f32 1.0, %v4271_v52 }
 0x950   : > { %v4273_v53 = vpop.eup %4272 }
 0x951   : > { %4284 = vrcp.f32 %v2614_v60  ;;  %v2613_v23 = vadd.f32 1.0, %v4273_v53 }
 0x952   : > { %v4275_v22 = vpop.eup %4274 }
 0x953   : > { %v2632_v0 = vmul.f32 %v4275_v22, %v5475_v57  ;;  %4286 = vrcp.f32 %v2613_v23 }
 0x954   : > { %v4277_v44 = vpop.eup %4276  ;;  %4288 = vrcp.f32 %v2609_v2 }
 0x955   : > { %v2688_v29 = vcombine.high %v2632_v0, %v4369_v12  ;;  %v2695_v50 = vrot.slane %v2632_v0, %v5515_v62  ;;  %v2631_v27 = vmul.f32 %v4277_v44, %v5480_v8 }
 0x956   : > { %v4279_v57 = vpop.eup %4278 }
 0x957   : > { %v2702_v9 = vrot.slane %v2688_v29, %v5515_v62  ;;  %v2639_v55 = vcombine.high %v2631_v27, %v4369_v12  ;;  %v5527_v28 = vrot.slane %v2695_v50, %v5519_v46  ;;  %v2646_v61 = vrot.slane %v2631_v27, %v5515_v62 }
 0x958   : > { %v2703_v40 = vcombine.high %v2695_v50, %v4369_v12  ;;  %v2634_v16 = vmul.f32 %v4279_v57, %v5485_v43 }
 0x959   : > { %v2733_v21 = vcombine.high %v5527_v28, %v4369_v12  ;;  %v5533_v41 = vrot.slane %v2702_v9, %v5519_v46  ;;  %v2653_v42 = vrot.slane %v2639_v55, %v5515_v62  ;;  %v2718_v32 = vcombine.high %v2702_v9, %v4369_v12 }
 0x95a   : > { %v2717_v13 = vrot.slane %v2703_v40, %v5519_v46  ;;  %v5546_v1 = vrot.slane %v2646_v61, %v5519_v46  ;;  %v2654_v20 = vcombine.high %v2646_v61, %v4369_v12  ;;  %v2793_v38 = vrot.slane %v2634_v16, %v5515_v62 }
 0x95b   : > { %v4281_v8 = vpop.eup %4280  ;;  %3056 = vrot.lane.b32.xlu0 %v2733_v21, %s4366_s10  ;;  %v2735_v33 = vcombine.high %v5533_v41, %v4369_v12  ;;  %v2732_v5 = vrot.slane %v2718_v32, %v5519_v46  ;;  %v5554_v43 = vrot.slane %v2653_v42, %v5519_v46  ;;  %v2669_v51 = vcombine.high %v2653_v42, %v4369_v12 }
 0x95c   : > { %v4283_v31 = vpop.eup %4282  ;;  %v2636_v26 = vmul.f32 %v4281_v8, %v5499_v7  ;;  %v2668_v10 = vrot.slane %v2654_v20, %v5519_v46  ;;  %v2734_v53 = vcombine.high %v2717_v13, %v4369_v12  ;;  %v5600_v56 = vrot.slane %v2793_v38, %v5519_v46 }
 0x95d   : > { %3068 = vrot.lane.b32.xlu1 %v2735_v33, %s4366_s10  ;;  %v2635_v35 = vmul.f32 %v4283_v31, %v5501_v19  ;;  %v2786_v19 = vcombine.high %v2634_v16, %v4369_v12  ;;  %v2686_v24 = vcombine.high %v5554_v43, %v4369_v12  ;;  %v2736_v22 = vcombine.high %v2732_v5, %v4369_v12 }
 0x95e   : > { %v4285_v45 = vpop.eup %4284  ;;  %v2884_v54 = vcombine.high %v2636_v26, %v4369_v12  ;;  %v2831_v8 = vcombine.high %v5600_v56, %v4369_v12  ;;  %v2801_v31 = vcombine.high %v2793_v38, %v4369_v12 }
 0x95f   : > { %v2638_v7 = vmul.f32 %v4285_v45, %v5507_v58  ;;  %3060 = vrot.lane.b32.xlu0 %v2717_v13, %s4364_s25  ;;  %v2684_v58 = vcombine.high %v5546_v1, %v4369_v12  ;;  %v2835_v14 = vcombine.high %v2635_v35, %v4369_v12  ;;  %v2800_v59 = vrot.slane %v2786_v19, %v5515_v62 }
 0x960   : > { %v4287_v47 = vpop.eup %4286  ;;  %v5572_v30 = vrot.slane %v2884_v54, %v5515_v62  ;;  %v5585_v39 = vrot.slane %v2635_v35, %v5515_v62 }
 0x961   : > { %v2982_v6 = vcombine.high %v2638_v7, %v4369_v12  ;;  %v2989_v49 = vrot.slane %v2638_v7, %v5515_v62  ;;  %v2637_v63 = vmul.f32 %v4287_v47, %v5511_v17  ;;  %v4289_v11 = vpop.eup %4288  ;;  %3072 = vrot.lane.b32.xlu1 %v2732_v5, %s4364_s25  ;;  %v5569_v17 = vrot.slane %v2636_v26, %v5515_v62 }
 0x962   : > { %v2633_v4 = vmul.f32 %v4289_v11, %v5493_v3  ;;  %v5588_v25 = vrot.slane %v2835_v14, %v5515_v62  ;;  %v2683_v3 = vrot.slane %v2669_v51, %v5519_v46  ;;  %v2914_v52 = vcombine.high %v5572_v30, %v4369_v12 }
 0x963   : > { %v2996_v18 = vrot.slane %v2982_v6, %v5515_v62  ;;  %v2933_v37 = vcombine.high %v2637_v63, %v4369_v12  ;;  %v2940_v15 = vrot.slane %v2637_v63, %v5515_v62  ;;  %3032 = vrot.lane.b32.xlu0 %v2684_v58, %s4366_s10  ;;  %v2899_v48 = vcombine.high %v5569_v17, %v4369_v12 }
 0x964   : > { %v2737_v60 = vcombine.high %v2633_v4, %v4369_v12  ;;  %v5606_v23 = vrot.slane %v2914_v52, %v5519_v46  ;;  %v5610_v0 = vrot.slane %v2800_v59, %v5519_v46  ;;  %v2850_v44 = vcombine.high %v5585_v39, %v4369_v12 }
 0x965   : > { %v2947_v34 = vrot.slane %v2933_v37, %v5515_v62  ;;  %3044 = vrot.lane.b32.xlu1 %v2686_v24, %s4366_s10  ;;  %v5603_v2 = vrot.slane %v2899_v48, %v5519_v46  ;;  %v2865_v29 = vcombine.high %v5588_v25, %v4369_v12  ;;  %v5626_v9 = vrot.slane %v2989_v49, %v5519_v46 }
 0x966   : > { %v5623_v27 = vcombine.high %v5606_v23, %v4369_v12  ;;  %v5629_v55 = vrot.slane %v2996_v18, %v5519_v46  ;;  %v5632_v57 = vrot.slane %v2850_v44, %v5519_v46  ;;  %v2997_v21 = vcombine.high %v2989_v49, %v4369_v12 }
 0x967   : > { %3036 = vrot.lane.b32.xlu0 %v2668_v10, %s4364_s25  ;;  %v5619_v50 = vcombine.high %v5603_v2, %v4369_v12  ;;  %v5635_v61 = vrot.slane %v2865_v29, %v5519_v46  ;;  %v3012_v40 = vcombine.high %v2996_v18, %v4369_v12  ;;  %v5644_v42 = vrot.slane %v2940_v15, %v5519_v46 }
 0x968   : > { %v5647_v26 = vrot.slane %v2947_v34, %v5519_v46  ;;  %v5650_v33 = vrot.slane %v2997_v21, %v5519_v46  ;;  %v5657_v45 = vcombine.high %v5632_v57, %v4369_v12  ;;  %v2833_v13 = vcombine.high %v5610_v0, %v4369_v12 }
 0x969   : > { %3048 = vrot.lane.b32.xlu1 %v2683_v3, %s4364_s25  ;;  %v5653_v32 = vrot.slane %v3012_v40, %v5519_v46  ;;  %v5661_v16 = vcombine.high %v5635_v61, %v4369_v12  ;;  %v2816_v35 = vcombine.high %v2800_v59, %v4369_v12  ;;  %v2948_v7 = vcombine.high %v2940_v15, %v4369_v12 }
 0x96a   : > { %v2963_v47 = vcombine.high %v2947_v34, %v4369_v12  ;;  %v5671_v54 = vcombine.high %v5650_v33, %v4369_v12  ;;  %v2744_v6 = vrot.slane %v2633_v4, %v5515_v62  ;;  %v2815_v49 = vrot.slane %v2801_v31, %v5519_v46 }
 0x96b   : > { %3064 = vrot.lane.b32.xlu0 %v2734_v53, %s4362_s23  ;;  %v5675_v5 = vcombine.high %v5653_v32, %v4369_v12  ;;  %v2962_v63 = vrot.slane %v2948_v7, %v5519_v46  ;;  %v2751_v19 = vrot.slane %v2737_v60, %v5515_v62  ;;  %v2830_v58 = vrot.slane %v2816_v35, %v5519_v46 }
 0x96c   : > { %v2977_v11 = vrot.slane %v2963_v47, %v5519_v46  ;;  %v2685_v18 = vcombine.high %v2668_v10, %v4369_v12  ;;  %v5690_v37 = vrot.slane %v2744_v6, %v5519_v46  ;;  %v2687_v15 = vcombine.high %v2683_v3, %v4369_v12 }
 0x96d   : > { %3076 = vrot.lane.b32.xlu1 %v2736_v22, %s4362_s23  ;;  %v2979_v20 = vcombine.high %v2962_v63, %v4369_v12  ;;  %v5695_v62 = vrot.slane %v2751_v19, %v5519_v46  ;;  %v2752_v51 = vcombine.high %v2744_v6, %v4369_v12  ;;  %v2767_v34 = vcombine.high %v2751_v19, %v4369_v12 }
 0x96e   : > { %v2981_v14 = vcombine.high %v2977_v11, %v4369_v12  ;;  %v2782_v24 = vcombine.high %v5690_v37, %v4369_v12  ;;  %v2832_v59 = vcombine.high %v2815_v49, %v4369_v12  ;;  %v5713_v3 = vrot.slane %v5569_v17, %v5519_v46 }
 0x96f   : > { %3104 = vrot.lane.b32.xlu0 %v2831_v8, %s4366_s10  ;;  %v2784_v4 = vcombine.high %v5695_v62, %v4369_v12  ;;  %v2766_v38 = vrot.slane %v2752_v51, %v5519_v46  ;;  %v2781_v10 = vrot.slane %v2767_v34, %v5519_v46  ;;  %v2834_v48 = vcombine.high %v2830_v58, %v4369_v12 }
 0x970   : > { %v5719_v52 = vrot.slane %v5572_v30, %v5519_v46  ;;  %v2929_v60 = vcombine.high %v5713_v3, %v4369_v12  ;;  %v5735_v30 = vrot.slane %v5585_v39, %v5519_v46  ;;  %v5741_v44 = vrot.slane %v5588_v25, %v5519_v46 }
 0x971   : > { %3116 = vrot.lane.b32.xlu1 %v2833_v13, %s4366_s10  ;;  %v2783_v17 = vcombine.high %v2766_v38, %v4369_v12  ;;  %v2785_v22 = vcombine.high %v2781_v10, %v4369_v12  ;;  %v3027_v46 = vcombine.high %v5626_v9, %v4369_v12  ;;  %v3029_v39 = vcombine.high %v5629_v55, %v4369_v12 }
 0x972   : > { %v2931_v53 = vcombine.high %v5719_v52, %v4369_v12  ;;  %v2978_v25 = vcombine.high %v5644_v42, %v4369_v12  ;;  %v2980_v29 = vcombine.high %v5647_v26, %v4369_v12 }
 0x973   : > { %3108 = vrot.lane.b32.xlu0 %v2815_v49, %s4364_s25 }
 0x975   : > { %3120 = vrot.lane.b32.xlu1 %v2830_v58, %s4364_s25 }
 0x977   : > { %3040 = vrot.lane.b32.xlu0 %v2685_v18, %s4362_s23 }
 0x979   : > { %3052 = vrot.lane.b32.xlu1 %v2687_v15, %s4362_s23 }
 0x97b   : > { %3080 = vrot.lane.b32.xlu0 %v2782_v24, %s4366_s10 }
 0x97d   : > { %3092 = vrot.lane.b32.xlu1 %v2784_v4, %s4366_s10 }
 0x97f   : > { %3084 = vrot.lane.b32.xlu0 %v2766_v38, %s4364_s25 }
 0x981   : > { %3096 = vrot.lane.b32.xlu1 %v2781_v10, %s4364_s25 }
 0x983   : > { %3112 = vrot.lane.b32.xlu0 %v2832_v59, %s4362_s23 }
 0x985   : > { %3124 = vrot.lane.b32.xlu1 %v2834_v48, %s4362_s23 }
 0x987   : > { %3152 = vrot.lane.b32.xlu0 %v2929_v60, %s4366_s10 }
 0x989   : > { %3164 = vrot.lane.b32.xlu1 %v2931_v53, %s4366_s10 }
 0x98b   : > { %3156 = vrot.lane.b32.xlu0 %v5603_v2, %s4364_s25  ;;  %v2880_v2 = vcombine.high %v5735_v30, %v4369_v12 }
 0x98d   : > { %3168 = vrot.lane.b32.xlu1 %v5606_v23, %s4364_s25  ;;  %v2882_v23 = vcombine.high %v5741_v44, %v4369_v12 }
 0x98f   : > { %3088 = vrot.lane.b32.xlu0 %v2783_v17, %s4362_s23 }
 0x991   : > { %3100 = vrot.lane.b32.xlu1 %v2785_v22, %s4362_s23 }
 0x993   : > { %3128 = vrot.lane.b32.xlu0 %v2880_v2, %s4366_s10 }
 0x995   : > { %3140 = vrot.lane.b32.xlu1 %v2882_v23, %s4366_s10 }
 0x997   : > { %3132 = vrot.lane.b32.xlu0 %v5632_v57, %s4364_s25 }
 0x999   : > { %3144 = vrot.lane.b32.xlu1 %v5635_v61, %s4364_s25 }
 0x99b   : > { %3160 = vrot.lane.b32.xlu0 %v5619_v50, %s4362_s23 }
 0x99d   : > { %3172 = vrot.lane.b32.xlu1 %v5623_v27, %s4362_s23 }
 0x99f   : > { %3200 = vrot.lane.b32.xlu0 %v3027_v46, %s4366_s10 }
 0x9a1   : > { %3212 = vrot.lane.b32.xlu1 %v3029_v39, %s4366_s10 }
 0x9a3   : > { %3204 = vrot.lane.b32.xlu0 %v5650_v33, %s4364_s25 }
 0x9a5   : > { %3216 = vrot.lane.b32.xlu1 %v5653_v32, %s4364_s25 }
 0x9a7   : > { %3136 = vrot.lane.b32.xlu0 %v5657_v45, %s4362_s23 }
 0x9a9   : > { %3148 = vrot.lane.b32.xlu1 %v5661_v16, %s4362_s23 }
 0x9ab   : > { %3176 = vrot.lane.b32.xlu0 %v2978_v25, %s4366_s10 }
 0x9ad   : > { %3188 = vrot.lane.b32.xlu1 %v2980_v29, %s4366_s10  ;;  %s4303_s10 = sshll.u32 %s4371_s9, 4  ;;  %s4304_s10 = int_to_ptr.vmem [resolvable:$false] %s4303_s10 }
 0x9ae   : > { %s4305_s12 = scalar_lea.vmem %s4304_s10, 512  ;;  %p4306_p0 = scmp.lt.s32.totalorder %s3406_s21, %s4304_s10 }
 0x9af   : > { %3180 = vrot.lane.b32.xlu0 %v2962_v63, %s4364_s25  ;;  %p4307_p1 = scmp.lt.s32.totalorder %s4305_s12, %s4299_s26 }
 0x9b1   : > { %3192 = vrot.lane.b32.xlu1 %v2977_v11, %s4364_s25  ;;  %v4370_v11 = vmov 1966171168   ;;  %s3391_s25 = scalar_lea.sflag [#allocation3], %s311_s13  ;;  %p4308_p2 = por %p4307_p1, %p4306_p0 }
 0x9b2   : > { %v3293_v19 = vunpack.c.l.s4 %v4370_v11 }
 0x9b3   : > { %3184 = vrot.lane.b32.xlu0 %v2979_v20, %s4362_s23  ;;  %p4309_p3 = pnand %p4308_p2, %p4302_p13 }
 0x9b4   : > { %v3294_v38 = vunpack.c.0.s8 %v3293_v19 }
 0x9b5   : > { %3196 = vrot.lane.b32.xlu1 %v2981_v14, %s4362_s23 }
 0x9b6   : > { %v5815_v23 = vsub.s32 %v3294_v38, %v4637_v36 }
 0x9b7   : > { %3208 = vrot.lane.b32.xlu0 %v5671_v54, %s4362_s23 }
 0x9b9   : > { %3220 = vrot.lane.b32.xlu1 %v5675_v5, %s4362_s23 }
 0x9cd   : > { %v3057_v50 = vpop.permute.xlu0 %3056 }
 0x9cf   : > { %v3069_v27 = vpop.permute.xlu1 %3068 }
 0x9d0   : > { %v3233_v15 = vsel %vm341_vm0, %v5533_v41, %v3069_v27 }
 0x9d1   : > { %v3061_v57 = vpop.permute.xlu0 %3060 }
 0x9d3   : > { %v3073_v12 = vpop.permute.xlu1 %3072 }
 0x9d4   : > { %v3234_v4 = vsel %vm1091_vm2, %v3233_v15, %v3073_v12 }
 0x9d5   : > { %v3033_v61 = vpop.permute.xlu0 %3032 }
 0x9d6   : > { %v3223_v24 = vsel %vm341_vm0, %v5546_v1, %v3033_v61 }
 0x9d7   : > { %v3045_v21 = vpop.permute.xlu1 %3044 }
 0x9d8   : > { %v3227_v20 = vsel %vm341_vm0, %v5554_v43, %v3045_v21  ;;  %v3230_v43 = vsel %vm341_vm0, %v5527_v28, %v3057_v50 }
 0x9d9   : > { %v3037_v40 = vpop.permute.xlu0 %3036  ;;  %v3231_v1 = vsel %vm1091_vm2, %v3230_v43, %v3061_v57 }
 0x9da   : > { %v3224_v34 = vsel %vm1091_vm2, %v3223_v24, %v3037_v40 }
 0x9db   : > { %v3049_v8 = vpop.permute.xlu1 %3048 }
 0x9dc   : > { %v3228_v14 = vsel %vm1091_vm2, %v3227_v20, %v3049_v8 }
 0x9dd   : > { %v3065_v31 = vpop.permute.xlu0 %3064 }
 0x9de   : > { %v3232_v22 = vsel %vm3225_vm3, %v3231_v1, %v3065_v31 }
 0x9df   : > { %v3077_v33 = vpop.permute.xlu1 %3076 }
 0x9e0   : > { %v3235_v59 = vsel %vm3225_vm3, %v3234_v4, %v3077_v33 }
 0x9e1   : > { %v3105_v32 = vpop.permute.xlu0 %3104  ;;  %v3289_v46 = vcombine.low %v3232_v22, %v3235_v59 }
 0x9e2   : > { %v3242_v2 = vsel %vm341_vm0, %v5600_v56, %v3105_v32 }
 0x9e3   : > { %v3117_v45 = vpop.permute.xlu1 %3116 }
 0x9e4   : > { %v3245_v41 = vsel %vm341_vm0, %v5610_v0, %v3117_v45 }
 0x9e5   : > { %v3109_v16 = vpop.permute.xlu0 %3108 }
 0x9e6   : > { %v3243_v0 = vsel %vm1091_vm2, %v3242_v2, %v3109_v16 }
 0x9e7   : > { %v3121_v13 = vpop.permute.xlu1 %3120 }
 0x9e8   : > { %v3246_v60 = vsel %vm1091_vm2, %v3245_v41, %v3121_v13 }
 0x9e9   : > { %v3041_v35 = vpop.permute.xlu0 %3040 }
 0x9ea   : > { %v3226_v48 = vsel %vm3225_vm3, %v3224_v34, %v3041_v35 }
 0x9eb   : > { %v3053_v7 = vpop.permute.xlu1 %3052 }
 0x9ec   : > { %v3229_v51 = vsel %vm3225_vm3, %v3228_v14, %v3053_v7 }
 0x9ed   : > { %v3081_v47 = vpop.permute.xlu0 %3080  ;;  %v3288_v53 = vcombine.low %v3226_v48, %v3229_v51 }
 0x9ee   : > { %v3236_v25 = vsel %vm341_vm0, %v5690_v37, %v3081_v47  ;;  %v3305_v37 = vrot.slane %v3289_v46, %v5815_v23 }
 0x9ef   : > { %v3093_v54 = vpop.permute.xlu1 %3092  ;;  %v3298_v56 = vrot.slane %v3288_v53, %v5815_v23 }
 0x9f0   : > { %v3239_v29 = vsel %vm341_vm0, %v5695_v62, %v3093_v54 }
 0x9f1   : > { %v3085_v6 = vpop.permute.xlu0 %3084  ;;  %v3320_v62 = vcombine.low %v3298_v56, %v3305_v37 }
 0x9f2   : > { %v3237_v27 = vsel %vm1091_vm2, %v3236_v25, %v3085_v6 }
 0x9f3   : > { %v3097_v5 = vpop.permute.xlu1 %3096  ;;  %v3328_v13 = vrot.slane %v3320_v62, %v5815_v23 }
 0x9f4   : > { %v3240_v36 = vsel %vm1091_vm2, %v3239_v29, %v3097_v5 }
 0x9f5   : > { %v3113_v49 = vpop.permute.xlu0 %3112 }
 0x9f6   : > { %v3244_v50 = vsel %vm3225_vm3, %v3243_v0, %v3113_v49 }
 0x9f7   : > { %v3125_v63 = vpop.permute.xlu1 %3124 }
 0x9f8   : > { %v3247_v28 = vsel %vm3225_vm3, %v3246_v60, %v3125_v63 }
 0x9f9   : > { %v5786_v58 = vpop.permute.xlu0 %3152  ;;  %v3291_v57 = vcombine.low %v3244_v50, %v3247_v28 }
 0x9fb   : > { %v5791_v18 = vpop.permute.xlu1 %3164  ;;  %v3319_v31 = vrot.slane %v3291_v57, %v5815_v23 }
 0x9fc   : > { %v3257_v38 = vsel %vm341_vm0, %v5719_v52, %v5791_v18 }
 0x9fd   : > { %v5800_v10 = vpop.permute.xlu0 %3156 }
 0x9ff   : > { %v3169_v17 = vpop.permute.xlu1 %3168 }
 0xa00   : > { %v3258_v41 = vsel %vm1091_vm2, %v3257_v38, %v3169_v17 }
 0xa01   : > { %v3089_v39 = vpop.permute.xlu0 %3088 }
 0xa02   : > { %v3238_v61 = vsel %vm3225_vm3, %v3237_v27, %v3089_v39 }
 0xa03   : > { %v3101_v12 = vpop.permute.xlu1 %3100 }
 0xa04   : > { %v3241_v21 = vsel %vm3225_vm3, %v3240_v36, %v3101_v12 }
 0xa05   : > { %v3290_v40 = vcombine.low %v3238_v61, %v3241_v21  ;;  %v3129_v8 = vpop.permute.xlu0 %3128 }
 0xa06   : > { %v3248_v43 = vsel %vm341_vm0, %v5735_v30, %v3129_v8 }
 0xa07   : > { %v3312_v33 = vrot.slane %v3290_v40, %v5815_v23  ;;  %v3141_v32 = vpop.permute.xlu1 %3140 }
 0xa08   : > { %v3251_v51 = vsel %vm341_vm0, %v5741_v44, %v3141_v32  ;;  %v3254_v44 = vsel %vm341_vm0, %v5713_v3, %v5786_v58 }
 0xa09   : > { %v3321_v45 = vcombine.low %v3312_v33, %v3319_v31  ;;  %v3133_v16 = vpop.permute.xlu0 %3132  ;;  %v3255_v30 = vsel %vm1091_vm2, %v3254_v44, %v5800_v10 }
 0xa0a   : > { %v3249_v48 = vsel %vm1091_vm2, %v3248_v43, %v3133_v16 }
 0xa0b   : > { %v3335_v35 = vrot.slane %v3321_v45, %v5815_v23  ;;  %v3145_v7 = vpop.permute.xlu1 %3144 }
 0xa0c   : > { %v3252_v4 = vsel %vm1091_vm2, %v3251_v51, %v3145_v7 }
 0xa0d   : > { %v3161_v47 = vpop.permute.xlu0 %3160  ;;  %v3336_v54 = vcombine.low %v3328_v13, %v3335_v35 }
 0xa0e   : > { %v3256_v2 = vsel %vm3225_vm3, %v3255_v30, %v3161_v47 }
 0xa0f   : > { %v3173_v6 = vpop.permute.xlu1 %3172  ;;  %3388 = vst [vmem:[%s5836_s19] sm:$0xff] %v3336_v54 }
 0xa10   : > { %v3259_v60 = vsel %vm3225_vm3, %v3258_v41, %v3173_v6 }
 0xa11   : > { %v3201_v5 = vpop.permute.xlu0 %3200  ;;  %v3338_v58 = vcombine.low %v3256_v2, %v3259_v60 }
 0xa13   : > { %v3213_v49 = vpop.permute.xlu1 %3212  ;;  %v3354_v36 = vrot.slane %v3338_v58, %v5815_v23 }
 0xa14   : > { %v3269_v10 = vsel %vm341_vm0, %v5629_v55, %v3213_v49 }
 0xa15   : > { %v3205_v63 = vpop.permute.xlu0 %3204 }
 0xa17   : > { %v3217_v11 = vpop.permute.xlu1 %3216 }
 0xa19   : > { %v3137_v19 = vpop.permute.xlu0 %3136 }
 0xa1a   : > { %v3250_v53 = vsel %vm3225_vm3, %v3249_v48, %v3137_v19 }
 0xa1b   : > { %v3149_v20 = vpop.permute.xlu1 %3148 }
 0xa1c   : > { %v3253_v59 = vsel %vm3225_vm3, %v3252_v4, %v3149_v20 }
 0xa1d   : > { %v3177_v14 = vpop.permute.xlu0 %3176  ;;  %v3337_v18 = vcombine.low %v3250_v53, %v3253_v59 }
 0xa1e   : > { %v3260_v28 = vsel %vm341_vm0, %v5644_v42, %v3177_v14  ;;  %v3270_v42 = vsel %vm1091_vm2, %v3269_v10, %v3217_v11 }
 0xa1f   : > { %v3189_v15 = vpop.permute.xlu1 %3188  ;;  %v3347_v29 = vrot.slane %v3337_v18, %v5815_v23 }
 0xa20   : > { %v3263_v52 = vsel %vm341_vm0, %v5647_v26, %v3189_v15  ;;  %v3266_v26 = vsel %vm341_vm0, %v5626_v9, %v3201_v5 }
 0xa21   : > { %v3181_v24 = vpop.permute.xlu0 %3180  ;;  %v3267_v25 = vsel %vm1091_vm2, %v3266_v26, %v3205_v63  ;;  %v3369_v57 = vcombine.low %v3347_v29, %v3354_v36 }
 0xa22   : > { %v3261_v46 = vsel %vm1091_vm2, %v3260_v28, %v3181_v24 }
 0xa23   : > { %v3193_v34 = vpop.permute.xlu1 %3192  ;;  %v3377_v37 = vrot.slane %v3369_v57, %v5815_v23 }
 0xa24   : > { %v3264_v17 = vsel %vm1091_vm2, %v3263_v52, %v3193_v34 }
 0xa25   : > { %v3185_v1 = vpop.permute.xlu0 %3184 }
 0xa26   : > { %v3262_v39 = vsel %vm3225_vm3, %v3261_v46, %v3185_v1 }
 0xa27   : > { %v3197_v22 = vpop.permute.xlu1 %3196 }
 0xa28   : > { %v3265_v3 = vsel %vm3225_vm3, %v3264_v17, %v3197_v22 }
 0xa29   : > { %v3209_v0 = vpop.permute.xlu0 %3208  ;;  %v3339_v50 = vcombine.low %v3262_v39, %v3265_v3 }
 0xa2a   : > { %v3268_v27 = vsel %vm3225_vm3, %v3267_v25, %v3209_v0 }
 0xa2b   : > { %v3221_v56 = vpop.permute.xlu1 %3220  ;;  %v3361_v12 = vrot.slane %v3339_v50, %v5815_v23 }
 0xa2c   : > { %v3271_v9 = vsel %vm3225_vm3, %v3270_v42, %v3221_v56 }
 0xa2d   : > { %v3340_v55 = vcombine.low %v3268_v27, %v3271_v9 }
 0xa2f   : > { %v3368_v61 = vrot.slane %v3340_v55, %v5815_v23 }
 0xa31   : > { %v3370_v21 = vcombine.low %v3361_v12, %v3368_v61 }
 0xa33   : > { %v3384_v40 = vrot.slane %v3370_v21, %v5815_v23 }
 0xa35   : > { %v3385_v8 = vcombine.low %v3377_v37, %v3384_v40 }
 0xa37   : > { %3389 = vst [vmem:[%s5836_s19 + $0x8] sm:$0xff] %v3385_v8 }
 0xa38   : > { %4312 = shalt.err (!%p4309_p3)
}
 0xa39   : > { %s4313_s17 = scalar_lea.hbm %s3403_s24, 256  ;;  %s4317_s19 = scalar_lea.hbm %s5925_s8, 512 }
 0xa3a   : > { %p4314_p4 = scmp.ne.s32.totalorder %s3403_s24, %s4313_s17  ;;  %p4318_p9 = scmp.lt.s32.totalorder %s3403_s24, %s5925_s8 }
 0xa3b   : > { %p4319_p10 = scmp.lt.s32.totalorder %s4317_s19, %s4313_s17 }
 0xa3c   : > { %p4315_p7 = pnand %p4314_p4, %p4455_p5 }
 0xa3d   : > { %p4320_p11 = por %p4319_p10, %p4318_p9 }
 0xa3e   : > { %p4316_p8 = pneg %p4315_p7 }
 0xa40   : > { %p4321_p12 = pnand %p4320_p11, %p4316_p8 }
 0xa42   : > { %4324 = shalt.err (!%p4321_p12)
}
 0xa43   : > { %4077 = dma.vmem_to_hbm [thread:$0]  (%p4455_p5), %s3406_s21, 256, %s3403_s24, %s3391_s25  }
 0xa44 PF: > { %p4083_p13 = scmp.ge.s32.totalorder %s4359_s30, 2  ;;  %s3417_s23 = sand.u32 1, %s4347_s27  }
 0xa45   : > { %s3418_s26 = scalar_lea.sflag [#allocation3], %s3417_s23 }
 0xa46   : > { %p4080_p0 = pnand %p4083_p13, %p4459_p6 }
 0xa48   : > { %p4081_p1 = pneg %p4080_p0 }
 0xa4a   : > { %4342 = dma.done.wait (%p4081_p1), %s3418_s26, 256  }
 0xa4b   : > { %4344 = vsyncadd (%p4081_p1), %s3418_s26, 4294967040  ;;  %p18_p2 = scmp.ge.s32.totalorder %s4442_s11, 4   ;;  %s5928_s27 = smov %s4351_s28 }
 0xa4c   : > { %s5929_s28 = smov %s4355_s29  ;;  %s5930_s29 = smov %s4453_s14 }
 0xa4d   : > { %s5931_s30 = smov %s4442_s11  ;;  %20 = sbr.rel (!%p18_p2) target bundleno = 3 (0x3), region = 90 }
 0xa52   :  { %3423 = vsyncpa [#allocation3], 1 }
 0xa53   :  { %3425 = vsyncpa [#allocation3 + $0x1], 1 }

</bundles_post_ra>
